<compile_context>
chip_gen: v6e
topology: v6e:2x2x1
jax: 0.10.0
libtpu: 0.0.40
codegen_flags: <defaults>
</compile_context>

<pallas_src>
import functools

import jax
import jax.numpy as jnp
from jax import lax
from jax.experimental import pallas as pl
from jax.experimental.pallas import tpu as pltpu

LANE = 128
SUBLANE_BF16 = 16            # bf16 sublane tile height (vreg packs [16, 128])


def _round_up(x, m):
    return (x + m - 1) // m * m


def _make_kernel(n_layers: int, kernel_size: int, seq_len: int,
                 batch_tile: int, c_pad: int, pad0: int):
    """Kernel processing `batch_tile` batch elements per grid step."""
    K = kernel_size
    L = seq_len
    B_T = batch_tile
    C = c_pad
    L_half = L // 2
    rows = B_T * L
    s0 = pad0 - (K - 1)        # scratch row where the causal window begins

    def kernel(x_ref, w_ref, b_ref, wr_ref, br_ref, o_ref, hp_ref):
        # hp_ref: (B_T, pad0 + L, C) bf16 persistent causal-padded activations.
        # Zero the causal pad rows every step (dense aligned store, tiny) --
        # see header comment for why this is NOT gated on program_id == 0.
        if pad0 > 0:
            hp_ref[:, :pad0, :] = jnp.zeros((B_T, pad0, C), jnp.bfloat16)
        hp_ref[:, pad0:, :] = x_ref[...]           # tile-aligned dense store

        h = None
        for layer in range(n_layers):              # static unroll over layers
            acc = None
            for k in range(K):                     # per-tap accumulating matmuls
                tap = hp_ref[:, s0 + k:s0 + k + L, :].reshape(rows, C)
                part = jnp.dot(tap, w_ref[layer, k],
                               preferred_element_type=jnp.float32)
                acc = part if acc is None else acc + part
            h = jnp.maximum(acc + b_ref[layer], 0.0)        # f32 bias + ReLU
            if layer + 1 < n_layers:
                hp_ref[:, pad0:, :] = h.astype(jnp.bfloat16).reshape(B_T, L, C)

        # Reduction conv: kernel_size=2, stride=2 -> halves the time axis.
        # Row-pair merge; batch boundaries preserved since L is even.
        h2 = h.astype(jnp.bfloat16).reshape(B_T * L_half, 2 * C)
        y = jnp.dot(h2, wr_ref[...],
                    preferred_element_type=jnp.float32) + br_ref[...]
        o_ref[...] = y.reshape(B_T, L_half, C)

    return kernel


def conv1d_block_no_dilation_no_skip(x_ncl, layer_weights, layer_biases,
                                     red_weight, red_bias, *, kernel_size,
                                     batch_tile=8):
    """Forward pass.

    Args:
      x_ncl:         (N, C_in, L) float32, PyTorch NCL layout.
      layer_weights: list of (F_out, F_in, K) PyTorch-layout conv weights.
      layer_biases:  list of (F_out,) biases.
      red_weight:    (F, F, 2) reduction conv weight (kernel_size=2, stride=2).
      red_bias:      (F,) reduction conv bias.
    Returns:
      (N, F, L // 2) float32 (PyTorch NCL layout).
    """
    n, c_in, seq = x_ncl.shape
    if seq % 2 != 0:
        raise ValueError("temporal dim must be even (block compresses by 2)")
    n_layers = len(layer_weights)
    f = layer_weights[-1].shape[0]
    K = kernel_size
    l_out = seq // 2
    c_pad = _round_up(max(c_in, f), LANE)          # lane-dense channel width
    pad0 = _round_up(K - 1, SUBLANE_BF16) if K > 1 else 0

    # Batch tile: largest divisor of n that (a) keeps >= 2 grid steps when
    # n >= 2 (so v7x's two TensorCores both get work on the "parallel" axis)
    # and (b) does not exceed batch_tile.  Bigger tiles amortize the
    # ~0.35us/step pipeline overhead and give the MXU a real M dimension.
    bt = max(1, min(batch_tile, n // 2 if n >= 2 else 1))
    while n % bt:
        bt -= 1

    # ---- layout glue (all padding / stacking done once, outside the kernel).
    x = jnp.transpose(x_ncl, (0, 2, 1)).astype(jnp.bfloat16)   # (N, L, C_in)
    x = jnp.pad(x, ((0, 0), (0, 0), (0, c_pad - c_in)))        # (N, L, Cp)

    w_blocks = []
    for w in layer_weights:
        f_out, f_in, _ = w.shape
        wk = jnp.transpose(w, (2, 1, 0))                       # (K, F_in, F_out)
        wk = jnp.pad(wk, ((0, 0), (0, c_pad - f_in), (0, c_pad - f_out)))
        w_blocks.append(wk)                                    # (K, Cp, Cp)
    w_all = jnp.stack(w_blocks).astype(jnp.bfloat16)           # (nl, K, Cp, Cp)

    b_all = jnp.stack([jnp.pad(b, (0, c_pad - b.shape[0]))
                       for b in layer_biases])
    b_all = b_all.reshape(n_layers, 1, c_pad).astype(jnp.float32)

    wr = jnp.transpose(red_weight, (2, 1, 0))                  # (2, F, F)
    wr = jnp.pad(wr, ((0, 0), (0, c_pad - f), (0, c_pad - f)))
    wr = wr.reshape(2 * c_pad, c_pad).astype(jnp.bfloat16)     # (2*Cp, Cp)
    br = jnp.pad(red_bias, (0, c_pad - f)).reshape(1, c_pad).astype(jnp.float32)

    # ---- explicit VMEM budget -> vmem_limit_bytes.
    x_tile = bt * seq * c_pad * 2                              # bf16
    out_tile = bt * l_out * c_pad * 4                          # f32
    const_bytes = (n_layers * K * c_pad * c_pad * 2            # w_all
                   + n_layers * 8 * c_pad * 4                  # b_all (padded)
                   + 2 * c_pad * c_pad * 2                     # wr
                   + 8 * c_pad * 4)                            # br (padded)
    hp_bytes = bt * (pad0 + seq) * c_pad * 2                   # bf16 scratch
    tmp_bytes = 6 * bt * seq * c_pad * 4                       # f32 acc/h + relayout slack
    budget = (2 * (x_tile + out_tile) + 2 * const_bytes
              + hp_bytes + tmp_bytes + (2 << 20))
    vmem_limit = int(min(max(budget, 16 << 20), 56 << 20))

    grid = (n // bt,)
    kernel = _make_kernel(n_layers, K, seq, bt, c_pad, pad0)

    def _run(single_buffer_consts):
        const_kw = ({"pipeline_mode": pl.Buffered(1)}
                    if single_buffer_consts else {})
        in_specs = [
            pl.BlockSpec((bt, seq, c_pad), lambda b: (b, 0, 0)),
            pl.BlockSpec((n_layers, K, c_pad, c_pad),
                         lambda b: (0, 0, 0, 0), **const_kw),
            pl.BlockSpec((n_layers, 1, c_pad), lambda b: (0, 0, 0), **const_kw),
            pl.BlockSpec((2 * c_pad, c_pad), lambda b: (0, 0), **const_kw),
            pl.BlockSpec((1, c_pad), lambda b: (0, 0), **const_kw),
        ]
        return pl.pallas_call(
            kernel,
            out_shape=jax.ShapeDtypeStruct((n, l_out, c_pad), jnp.float32),
            grid=grid,
            in_specs=in_specs,
            out_specs=pl.BlockSpec((bt, l_out, c_pad), lambda b: (b, 0, 0)),
            scratch_shapes=[pltpu.VMEM((bt, pad0 + seq, c_pad), jnp.bfloat16)],
            compiler_params=pltpu.CompilerParams(
                dimension_semantics=("parallel",),
                vmem_limit_bytes=vmem_limit),
        )(x, w_all, b_all, wr, br)

    try:
        out = _run(True)        # single-buffer the grid-constant operands
    except Exception:           # pipeline_mode / Buffered(1) unsupported here;
        out = _run(False)       # only cost: double-buffered constant weights.

    # Drop padded channels, back to PyTorch NCL layout.
    return jnp.transpose(out[..., :f], (0, 2, 1))              # (N, F, L//2)


def _ref_forward(x_ncl, layer_weights, layer_biases, red_weight, red_bias,
                 *, kernel_size):
    """Pure-JAX f32 reference using lax.conv (causal padding, same semantics)."""
    h = x_ncl
    for w, b in zip(layer_weights, layer_biases):
        h = lax.conv_general_dilated(
            h, w, window_strides=(1,), padding=[(kernel_size - 1, 0)],
            dimension_numbers=("NCH", "OIH", "NCH"))
        h = jnp.maximum(h + b[None, :, None], 0.0)
    h = lax.conv_general_dilated(
        h, red_weight, window_strides=(2,), padding=[(0, 0)],
        dimension_numbers=("NCH", "OIH", "NCH"))
    return h + red_bias[None, :, None]


if __name__ == "__main__":
    # Small shapes consistent with the module's constructor.
    N = 2                 # batch
    C_IN = 4              # n_input_channels (e.g. n_mels)
    L_IN = 16             # input_len (temporal dim)
    N_LAYERS = 2          # n_layers
    F = 8                 # n_filters_per_layer
    K = 3                 # kernel_size
    # stride = 1, dilation = False, reduction_strat = 'conv'

    key = jax.random.PRNGKey(0)
    keys = jax.random.split(key, 2 * N_LAYERS + 3)

    x = jax.random.normal(keys[0], (N, C_IN, L_IN), dtype=jnp.float32)

    layer_weights, layer_biases = [], []
    c = C_IN
    for i in range(N_LAYERS):
        w = 0.1 * jax.random.normal(keys[1 + 2 * i], (F, c, K), dtype=jnp.float32)
        b = 0.1 * jax.random.normal(keys[2 + 2 * i], (F,), dtype=jnp.float32)
        layer_weights.append(w)
        layer_biases.append(b)
        c = F

    red_w = 0.1 * jax.random.normal(keys[-2], (F, F, 2), dtype=jnp.float32)
    red_b = 0.1 * jax.random.normal(keys[-1], (F,), dtype=jnp.float32)

    fwd = functools.partial(conv1d_block_no_dilation_no_skip, kernel_size=K)
    y = jax.block_until_ready(fwd(x, layer_weights, layer_biases, red_w, red_b))

    y_ref = _ref_forward(x, layer_weights, layer_biases, red_w, red_b,
                         kernel_size=K)
    assert y.shape == (N, F, L_IN // 2), y.shape
    # bf16 matmul operands / bf16 inter-layer activations with f32 accumulation.
    assert jnp.allclose(y, y_ref, atol=1e-2, rtol=2e-2), "mismatch vs reference"

    print("KERNEL_OK")
</pallas_src>

<mosaic_0001>
module attributes {stable_mosaic.version = 11 : i64} {
  func.func @kernel(%arg0: i32, %arg1: memref<1x16x128xbf16, #tpu.memory_space<vmem>>, %arg2: memref<2x3x128x128xbf16, #tpu.memory_space<vmem>>, %arg3: memref<2x1x128xf32, #tpu.memory_space<vmem>>, %arg4: memref<256x128xbf16, #tpu.memory_space<vmem>>, %arg5: memref<1x128xf32, #tpu.memory_space<vmem>>, %arg6: memref<1x8x128xf32, #tpu.memory_space<vmem>>, %arg7: memref<1x32x128xbf16, #tpu.memory_space<vmem>>) attributes {dimension_semantics = [#tpu.dimension_semantics<parallel>], iteration_bounds = array<i64: 2>, scalar_prefetch = 0 : i64, scratch_operands = 1 : i64, tpu.core_type = #tpu.core_type<tc>, window_params = [{transform_indices = @transform_0, window_bounds = array<i64: 1, 16, 128>}, {pipeline_mode = #tpu.pipeline_mode<synchronous>, transform_indices = @transform_1, window_bounds = array<i64: 2, 3, 128, 128>}, {pipeline_mode = #tpu.pipeline_mode<synchronous>, transform_indices = @transform_2, window_bounds = array<i64: 2, 1, 128>}, {pipeline_mode = #tpu.pipeline_mode<synchronous>, transform_indices = @transform_3, window_bounds = array<i64: 256, 128>}, {pipeline_mode = #tpu.pipeline_mode<synchronous>, transform_indices = @transform_4, window_bounds = array<i64: 1, 128>}, {transform_indices = @transform_5, window_bounds = array<i64: 1, 8, 128>}]} {
    %cst = arith.constant 0.000000e+00 : bf16
    %0 = vector.broadcast %cst : bf16 to vector<1x16x128xbf16>
    %c0 = arith.constant 0 : index
    %c0_0 = arith.constant 0 : index
    %c0_1 = arith.constant 0 : index
    %1 = vector.load %arg7[%c0, %c0_0, %c0_1] : memref<1x32x128xbf16, #tpu.memory_space<vmem>>, vector<1x16x128xbf16>
    tpu.vector_store %arg7[%c0, %c0_0, %c0_1], %0 {strides = array<i32>} : memref<1x32x128xbf16, #tpu.memory_space<vmem>>, vector<1x16x128xbf16>,
    %c0_2 = arith.constant 0 : index
    %c0_3 = arith.constant 0 : index
    %c0_4 = arith.constant 0 : index
    %2 = vector.load %arg1[%c0_2, %c0_3, %c0_4] : memref<1x16x128xbf16, #tpu.memory_space<vmem>>, vector<1x16x128xbf16>
    %c0_5 = arith.constant 0 : index
    %c16 = arith.constant 16 : index
    %c0_6 = arith.constant 0 : index
    %3 = vector.load %arg7[%c0_5, %c16, %c0_6] : memref<1x32x128xbf16, #tpu.memory_space<vmem>>, vector<1x16x128xbf16>
    tpu.vector_store %arg7[%c0_5, %c16, %c0_6], %2 {strides = array<i32>} : memref<1x32x128xbf16, #tpu.memory_space<vmem>>, vector<1x16x128xbf16>,
    %c0_7 = arith.constant 0 : index
    %c14 = arith.constant 14 : index
    %c0_8 = arith.constant 0 : index
    %4 = vector.load %arg7[%c0_7, %c14, %c0_8] : memref<1x32x128xbf16, #tpu.memory_space<vmem>>, vector<1x16x128xbf16>
    %5 = vector.shape_cast %4 : vector<1x16x128xbf16> to vector<16x128xbf16>
    %c0_9 = arith.constant 0 : index
    %c0_10 = arith.constant 0 : index
    %c0_11 = arith.constant 0 : index
    %c0_12 = arith.constant 0 : index
    %6 = vector.load %arg2[%c0_9, %c0_10, %c0_11, %c0_12] : memref<2x3x128x128xbf16, #tpu.memory_space<vmem>>, vector<1x1x128x128xbf16>
    %7 = vector.shape_cast %6 : vector<1x1x128x128xbf16> to vector<128x128xbf16>
    %cst_13 = arith.constant dense<0.000000e+00> : vector<16x128xf32>
    %8 = tpu.matmul %5, %7, %cst_13 {dimension_numbers = #tpu.dot_dimension_numbers<[1], [0], [0], [1], [0, 0, 1, 1], [], []>} : vector<16x128xbf16>, vector<128x128xbf16>, vector<16x128xf32> -> vector<16x128xf32>
    %c0_14 = arith.constant 0 : index
    %c15 = arith.constant 15 : index
    %c0_15 = arith.constant 0 : index
    %9 = vector.load %arg7[%c0_14, %c15, %c0_15] : memref<1x32x128xbf16, #tpu.memory_space<vmem>>, vector<1x16x128xbf16>
    %10 = vector.shape_cast %9 : vector<1x16x128xbf16> to vector<16x128xbf16>
    %c0_16 = arith.constant 0 : index
    %c1 = arith.constant 1 : index
    %c0_17 = arith.constant 0 : index
    %c0_18 = arith.constant 0 : index
    %11 = vector.load %arg2[%c0_16, %c1, %c0_17, %c0_18] : memref<2x3x128x128xbf16, #tpu.memory_space<vmem>>, vector<1x1x128x128xbf16>
    %12 = vector.shape_cast %11 : vector<1x1x128x128xbf16> to vector<128x128xbf16>
    %cst_19 = arith.constant dense<0.000000e+00> : vector<16x128xf32>
    %13 = tpu.matmul %10, %12, %cst_19 {dimension_numbers = #tpu.dot_dimension_numbers<[1], [0], [0], [1], [0, 0, 1, 1], [], []>} : vector<16x128xbf16>, vector<128x128xbf16>, vector<16x128xf32> -> vector<16x128xf32>
    %14 = arith.addf %8, %13 : vector<16x128xf32>
    %c0_20 = arith.constant 0 : index
    %c16_21 = arith.constant 16 : index
    %c0_22 = arith.constant 0 : index
    %15 = vector.load %arg7[%c0_20, %c16_21, %c0_22] : memref<1x32x128xbf16, #tpu.memory_space<vmem>>, vector<1x16x128xbf16>
    %16 = vector.shape_cast %15 : vector<1x16x128xbf16> to vector<16x128xbf16>
    %c0_23 = arith.constant 0 : index
    %c2 = arith.constant 2 : index
    %c0_24 = arith.constant 0 : index
    %c0_25 = arith.constant 0 : index
    %17 = vector.load %arg2[%c0_23, %c2, %c0_24, %c0_25] : memref<2x3x128x128xbf16, #tpu.memory_space<vmem>>, vector<1x1x128x128xbf16>
    %18 = vector.shape_cast %17 : vector<1x1x128x128xbf16> to vector<128x128xbf16>
    %cst_26 = arith.constant dense<0.000000e+00> : vector<16x128xf32>
    %19 = tpu.matmul %16, %18, %cst_26 {dimension_numbers = #tpu.dot_dimension_numbers<[1], [0], [0], [1], [0, 0, 1, 1], [], []>} : vector<16x128xbf16>, vector<128x128xbf16>, vector<16x128xf32> -> vector<16x128xf32>
    %20 = arith.addf %14, %19 : vector<16x128xf32>
    %c0_27 = arith.constant 0 : index
    %c0_28 = arith.constant 0 : index
    %c0_29 = arith.constant 0 : index
    %21 = vector.load %arg3[%c0_27, %c0_28, %c0_29] : memref<2x1x128xf32, #tpu.memory_space<vmem>>, vector<1x1x128xf32>
    %22 = vector.shape_cast %21 : vector<1x1x128xf32> to vector<1x128xf32>
    %23 = vector.broadcast %22 : vector<1x128xf32> to vector<16x128xf32>
    %24 = arith.addf %20, %23 : vector<16x128xf32>
    %cst_30 = arith.constant 0.000000e+00 : f32
    %25 = vector.broadcast %cst_30 : f32 to vector<16x128xf32>
    %26 = arith.maximumf %24, %25 : vector<16x128xf32>
    %27 = arith.truncf %26 : vector<16x128xf32> to vector<16x128xbf16>
    %28 = vector.shape_cast %27 : vector<16x128xbf16> to vector<1x16x128xbf16>
    %c0_31 = arith.constant 0 : index
    %c16_32 = arith.constant 16 : index
    %c0_33 = arith.constant 0 : index
    %29 = vector.load %arg7[%c0_31, %c16_32, %c0_33] : memref<1x32x128xbf16, #tpu.memory_space<vmem>>, vector<1x16x128xbf16>
    tpu.vector_store %arg7[%c0_31, %c16_32, %c0_33], %28 {strides = array<i32>} : memref<1x32x128xbf16, #tpu.memory_space<vmem>>, vector<1x16x128xbf16>,
    %c0_34 = arith.constant 0 : index
    %c14_35 = arith.constant 14 : index
    %c0_36 = arith.constant 0 : index
    %30 = vector.load %arg7[%c0_34, %c14_35, %c0_36] : memref<1x32x128xbf16, #tpu.memory_space<vmem>>, vector<1x16x128xbf16>
    %31 = vector.shape_cast %30 : vector<1x16x128xbf16> to vector<16x128xbf16>
    %c1_37 = arith.constant 1 : index
    %c0_38 = arith.constant 0 : index
    %c0_39 = arith.constant 0 : index
    %c0_40 = arith.constant 0 : index
    %32 = vector.load %arg2[%c1_37, %c0_38, %c0_39, %c0_40] : memref<2x3x128x128xbf16, #tpu.memory_space<vmem>>, vector<1x1x128x128xbf16>
    %33 = vector.shape_cast %32 : vector<1x1x128x128xbf16> to vector<128x128xbf16>
    %cst_41 = arith.constant dense<0.000000e+00> : vector<16x128xf32>
    %34 = tpu.matmul %31, %33, %cst_41 {dimension_numbers = #tpu.dot_dimension_numbers<[1], [0], [0], [1], [0, 0, 1, 1], [], []>} : vector<16x128xbf16>, vector<128x128xbf16>, vector<16x128xf32> -> vector<16x128xf32>
    %c0_42 = arith.constant 0 : index
    %c15_43 = arith.constant 15 : index
    %c0_44 = arith.constant 0 : index
    %35 = vector.load %arg7[%c0_42, %c15_43, %c0_44] : memref<1x32x128xbf16, #tpu.memory_space<vmem>>, vector<1x16x128xbf16>
    %36 = vector.shape_cast %35 : vector<1x16x128xbf16> to vector<16x128xbf16>
    %c1_45 = arith.constant 1 : index
    %c1_46 = arith.constant 1 : index
    %c0_47 = arith.constant 0 : index
    %c0_48 = arith.constant 0 : index
    %37 = vector.load %arg2[%c1_45, %c1_46, %c0_47, %c0_48] : memref<2x3x128x128xbf16, #tpu.memory_space<vmem>>, vector<1x1x128x128xbf16>
    %38 = vector.shape_cast %37 : vector<1x1x128x128xbf16> to vector<128x128xbf16>
    %cst_49 = arith.constant dense<0.000000e+00> : vector<16x128xf32>
    %39 = tpu.matmul %36, %38, %cst_49 {dimension_numbers = #tpu.dot_dimension_numbers<[1], [0], [0], [1], [0, 0, 1, 1], [], []>} : vector<16x128xbf16>, vector<128x128xbf16>, vector<16x128xf32> -> vector<16x128xf32>
    %40 = arith.addf %34, %39 : vector<16x128xf32>
    %c0_50 = arith.constant 0 : index
    %c16_51 = arith.constant 16 : index
    %c0_52 = arith.constant 0 : index
    %41 = vector.load %arg7[%c0_50, %c16_51, %c0_52] : memref<1x32x128xbf16, #tpu.memory_space<vmem>>, vector<1x16x128xbf16>
    %42 = vector.shape_cast %41 : vector<1x16x128xbf16> to vector<16x128xbf16>
    %c1_53 = arith.constant 1 : index
    %c2_54 = arith.constant 2 : index
    %c0_55 = arith.constant 0 : index
    %c0_56 = arith.constant 0 : index
    %43 = vector.load %arg2[%c1_53, %c2_54, %c0_55, %c0_56] : memref<2x3x128x128xbf16, #tpu.memory_space<vmem>>, vector<1x1x128x128xbf16>
    %44 = vector.shape_cast %43 : vector<1x1x128x128xbf16> to vector<128x128xbf16>
    %cst_57 = arith.constant dense<0.000000e+00> : vector<16x128xf32>
    %45 = tpu.matmul %42, %44, %cst_57 {dimension_numbers = #tpu.dot_dimension_numbers<[1], [0], [0], [1], [0, 0, 1, 1], [], []>} : vector<16x128xbf16>, vector<128x128xbf16>, vector<16x128xf32> -> vector<16x128xf32>
    %46 = arith.addf %40, %45 : vector<16x128xf32>
    %c1_58 = arith.constant 1 : index
    %c0_59 = arith.constant 0 : index
    %c0_60 = arith.constant 0 : index
    %47 = vector.load %arg3[%c1_58, %c0_59, %c0_60] : memref<2x1x128xf32, #tpu.memory_space<vmem>>, vector<1x1x128xf32>
    %48 = vector.shape_cast %47 : vector<1x1x128xf32> to vector<1x128xf32>
    %49 = vector.broadcast %48 : vector<1x128xf32> to vector<16x128xf32>
    %50 = arith.addf %46, %49 : vector<16x128xf32>
    %cst_61 = arith.constant 0.000000e+00 : f32
    %51 = vector.broadcast %cst_61 : f32 to vector<16x128xf32>
    %52 = arith.maximumf %50, %51 : vector<16x128xf32>
    %53 = arith.truncf %52 : vector<16x128xf32> to vector<16x128xbf16>
    %54 = vector.shape_cast %53 : vector<16x128xbf16> to vector<8x256xbf16>
    %c0_62 = arith.constant 0 : index
    %c0_63 = arith.constant 0 : index
    %55 = vector.load %arg4[%c0_62, %c0_63] : memref<256x128xbf16, #tpu.memory_space<vmem>>, vector<256x128xbf16>
    %cst_64 = arith.constant dense<0.000000e+00> : vector<8x128xf32>
    %56 = tpu.matmul %54, %55, %cst_64 {dimension_numbers = #tpu.dot_dimension_numbers<[1], [0], [0], [1], [0, 0, 1, 1], [], []>} : vector<8x256xbf16>, vector<256x128xbf16>, vector<8x128xf32> -> vector<8x128xf32>
    %c0_65 = arith.constant 0 : index
    %c0_66 = arith.constant 0 : index
    %57 = vector.load %arg5[%c0_65, %c0_66] : memref<1x128xf32, #tpu.memory_space<vmem>>, vector<1x128xf32>
    %58 = vector.broadcast %57 : vector<1x128xf32> to vector<8x128xf32>
    %59 = arith.addf %56, %58 : vector<8x128xf32>
    %60 = vector.shape_cast %59 : vector<8x128xf32> to vector<1x8x128xf32>
    %c0_67 = arith.constant 0 : index
    %c0_68 = arith.constant 0 : index
    %c0_69 = arith.constant 0 : index
    %61 = vector.load %arg6[%c0_67, %c0_68, %c0_69] : memref<1x8x128xf32, #tpu.memory_space<vmem>>, vector<1x8x128xf32>
    tpu.vector_store %arg6[%c0_67, %c0_68, %c0_69], %60 {strides = array<i32>} : memref<1x8x128xf32, #tpu.memory_space<vmem>>, vector<1x8x128xf32>,
    return
  }
  func.func @transform_0(%arg0: i32) -> (i32, i32, i32) {
    %c0_i32 = arith.constant 0 : i32
    %c0_i32_0 = arith.constant 0 : i32
    %c0_i32_1 = arith.constant 0 : i32
    return %arg0, %c0_i32, %c0_i32_0 : i32, i32, i32
  }
  func.func @transform_1(%arg0: i32) -> (i32, i32, i32, i32) {
    %c0_i32 = arith.constant 0 : i32
    %c0_i32_0 = arith.constant 0 : i32
    %c0_i32_1 = arith.constant 0 : i32
    %c0_i32_2 = arith.constant 0 : i32
    %c0_i32_3 = arith.constant 0 : i32
    return %c0_i32, %c0_i32_0, %c0_i32_1, %c0_i32_2 : i32, i32, i32, i32
  }
  func.func @transform_2(%arg0: i32) -> (i32, i32, i32) {
    %c0_i32 = arith.constant 0 : i32
    %c0_i32_0 = arith.constant 0 : i32
    %c0_i32_1 = arith.constant 0 : i32
    %c0_i32_2 = arith.constant 0 : i32
    return %c0_i32, %c0_i32_0, %c0_i32_1 : i32, i32, i32
  }
  func.func @transform_3(%arg0: i32) -> (i32, i32) {
    %c0_i32 = arith.constant 0 : i32
    %c0_i32_0 = arith.constant 0 : i32
    %c0_i32_1 = arith.constant 0 : i32
    return %c0_i32, %c0_i32_0 : i32, i32
  }
  func.func @transform_4(%arg0: i32) -> (i32, i32) {
    %c0_i32 = arith.constant 0 : i32
    %c0_i32_0 = arith.constant 0 : i32
    %c0_i32_1 = arith.constant 0 : i32
    return %c0_i32, %c0_i32_0 : i32, i32
  }
  func.func @transform_5(%arg0: i32) -> (i32, i32, i32) {
    %c0_i32 = arith.constant 0 : i32
    %c0_i32_0 = arith.constant 0 : i32
    %c0_i32_1 = arith.constant 0 : i32
    return %arg0, %c0_i32, %c0_i32_0 : i32, i32, i32
  }
}

module attributes {stable_mosaic.version = 11 : i64} {
  func.func @kernel(%arg0: i32, %arg1: memref<1x16x128xbf16, #tpu.memory_space<vmem>>, %arg2: memref<2x3x128x128xbf16, #tpu.memory_space<vmem>>, %arg3: memref<2x1x128xf32, #tpu.memory_space<vmem>>, %arg4: memref<256x128xbf16, #tpu.memory_space<vmem>>, %arg5: memref<1x128xf32, #tpu.memory_space<vmem>>, %arg6: memref<1x8x128xf32, #tpu.memory_space<vmem>>, %arg7: memref<1x32x128xbf16, #tpu.memory_space<vmem>>) attributes {dimension_semantics = [#tpu.dimension_semantics<parallel>], iteration_bounds = array<i64: 2>, scalar_prefetch = 0 : i64, scratch_operands = 1 : i64, tpu.core_type = #tpu.core_type<tc>, window_params = [{transform_indices = @transform_0, window_bounds = array<i64: 1, 16, 128>}, {pipeline_mode = #tpu.pipeline_mode<synchronous>, transform_indices = @transform_1, window_bounds = array<i64: 2, 3, 128, 128>}, {pipeline_mode = #tpu.pipeline_mode<synchronous>, transform_indices = @transform_2, window_bounds = array<i64: 2, 1, 128>}, {pipeline_mode = #tpu.pipeline_mode<synchronous>, transform_indices = @transform_3, window_bounds = array<i64: 256, 128>}, {pipeline_mode = #tpu.pipeline_mode<synchronous>, transform_indices = @transform_4, window_bounds = array<i64: 1, 128>}, {transform_indices = @transform_5, window_bounds = array<i64: 1, 8, 128>}]} {
    %cst = arith.constant 0.000000e+00 : bf16
    %0 = vector.broadcast %cst : bf16 to vector<1x16x128xbf16>
    %c0 = arith.constant 0 : index
    %c0_0 = arith.constant 0 : index
    %c0_1 = arith.constant 0 : index
    %1 = vector.load %arg7[%c0, %c0_0, %c0_1] : memref<1x32x128xbf16, #tpu.memory_space<vmem>>, vector<1x16x128xbf16>
    tpu.vector_store %arg7[%c0, %c0_0, %c0_1], %0 {strides = array<i32>} : memref<1x32x128xbf16, #tpu.memory_space<vmem>>, vector<1x16x128xbf16>,
    %c0_2 = arith.constant 0 : index
    %c0_3 = arith.constant 0 : index
    %c0_4 = arith.constant 0 : index
    %2 = vector.load %arg1[%c0_2, %c0_3, %c0_4] : memref<1x16x128xbf16, #tpu.memory_space<vmem>>, vector<1x16x128xbf16>
    %c0_5 = arith.constant 0 : index
    %c16 = arith.constant 16 : index
    %c0_6 = arith.constant 0 : index
    %3 = vector.load %arg7[%c0_5, %c16, %c0_6] : memref<1x32x128xbf16, #tpu.memory_space<vmem>>, vector<1x16x128xbf16>
    tpu.vector_store %arg7[%c0_5, %c16, %c0_6], %2 {strides = array<i32>} : memref<1x32x128xbf16, #tpu.memory_space<vmem>>, vector<1x16x128xbf16>,
    %c0_7 = arith.constant 0 : index
    %c14 = arith.constant 14 : index
    %c0_8 = arith.constant 0 : index
    %4 = vector.load %arg7[%c0_7, %c14, %c0_8] : memref<1x32x128xbf16, #tpu.memory_space<vmem>>, vector<1x16x128xbf16>
    %5 = vector.shape_cast %4 : vector<1x16x128xbf16> to vector<16x128xbf16>
    %c0_9 = arith.constant 0 : index
    %c0_10 = arith.constant 0 : index
    %c0_11 = arith.constant 0 : index
    %c0_12 = arith.constant 0 : index
    %6 = vector.load %arg2[%c0_9, %c0_10, %c0_11, %c0_12] : memref<2x3x128x128xbf16, #tpu.memory_space<vmem>>, vector<1x1x128x128xbf16>
    %7 = vector.shape_cast %6 : vector<1x1x128x128xbf16> to vector<128x128xbf16>
    %cst_13 = arith.constant dense<0.000000e+00> : vector<16x128xf32>
    %8 = tpu.matmul %5, %7, %cst_13 {dimension_numbers = #tpu.dot_dimension_numbers<[1], [0], [0], [1], [0, 0, 1, 1], [], []>} : vector<16x128xbf16>, vector<128x128xbf16>, vector<16x128xf32> -> vector<16x128xf32>
    %c0_14 = arith.constant 0 : index
    %c15 = arith.constant 15 : index
    %c0_15 = arith.constant 0 : index
    %9 = vector.load %arg7[%c0_14, %c15, %c0_15] : memref<1x32x128xbf16, #tpu.memory_space<vmem>>, vector<1x16x128xbf16>
    %10 = vector.shape_cast %9 : vector<1x16x128xbf16> to vector<16x128xbf16>
    %c0_16 = arith.constant 0 : index
    %c1 = arith.constant 1 : index
    %c0_17 = arith.constant 0 : index
    %c0_18 = arith.constant 0 : index
    %11 = vector.load %arg2[%c0_16, %c1, %c0_17, %c0_18] : memref<2x3x128x128xbf16, #tpu.memory_space<vmem>>, vector<1x1x128x128xbf16>
    %12 = vector.shape_cast %11 : vector<1x1x128x128xbf16> to vector<128x128xbf16>
    %cst_19 = arith.constant dense<0.000000e+00> : vector<16x128xf32>
    %13 = tpu.matmul %10, %12, %cst_19 {dimension_numbers = #tpu.dot_dimension_numbers<[1], [0], [0], [1], [0, 0, 1, 1], [], []>} : vector<16x128xbf16>, vector<128x128xbf16>, vector<16x128xf32> -> vector<16x128xf32>
    %14 = arith.addf %8, %13 : vector<16x128xf32>
    %c0_20 = arith.constant 0 : index
    %c16_21 = arith.constant 16 : index
    %c0_22 = arith.constant 0 : index
    %15 = vector.load %arg7[%c0_20, %c16_21, %c0_22] : memref<1x32x128xbf16, #tpu.memory_space<vmem>>, vector<1x16x128xbf16>
    %16 = vector.shape_cast %15 : vector<1x16x128xbf16> to vector<16x128xbf16>
    %c0_23 = arith.constant 0 : index
    %c2 = arith.constant 2 : index
    %c0_24 = arith.constant 0 : index
    %c0_25 = arith.constant 0 : index
    %17 = vector.load %arg2[%c0_23, %c2, %c0_24, %c0_25] : memref<2x3x128x128xbf16, #tpu.memory_space<vmem>>, vector<1x1x128x128xbf16>
    %18 = vector.shape_cast %17 : vector<1x1x128x128xbf16> to vector<128x128xbf16>
    %cst_26 = arith.constant dense<0.000000e+00> : vector<16x128xf32>
    %19 = tpu.matmul %16, %18, %cst_26 {dimension_numbers = #tpu.dot_dimension_numbers<[1], [0], [0], [1], [0, 0, 1, 1], [], []>} : vector<16x128xbf16>, vector<128x128xbf16>, vector<16x128xf32> -> vector<16x128xf32>
    %20 = arith.addf %14, %19 : vector<16x128xf32>
    %c0_27 = arith.constant 0 : index
    %c0_28 = arith.constant 0 : index
    %c0_29 = arith.constant 0 : index
    %21 = vector.load %arg3[%c0_27, %c0_28, %c0_29] : memref<2x1x128xf32, #tpu.memory_space<vmem>>, vector<1x1x128xf32>
    %22 = vector.shape_cast %21 : vector<1x1x128xf32> to vector<1x128xf32>
    %23 = vector.broadcast %22 : vector<1x128xf32> to vector<16x128xf32>
    %24 = arith.addf %20, %23 : vector<16x128xf32>
    %cst_30 = arith.constant 0.000000e+00 : f32
    %25 = vector.broadcast %cst_30 : f32 to vector<16x128xf32>
    %26 = arith.maximumf %24, %25 : vector<16x128xf32>
    %27 = arith.truncf %26 : vector<16x128xf32> to vector<16x128xbf16>
    %28 = vector.shape_cast %27 : vector<16x128xbf16> to vector<1x16x128xbf16>
    %c0_31 = arith.constant 0 : index
    %c16_32 = arith.constant 16 : index
    %c0_33 = arith.constant 0 : index
    %29 = vector.load %arg7[%c0_31, %c16_32, %c0_33] : memref<1x32x128xbf16, #tpu.memory_space<vmem>>, vector<1x16x128xbf16>
    tpu.vector_store %arg7[%c0_31, %c16_32, %c0_33], %28 {strides = array<i32>} : memref<1x32x128xbf16, #tpu.memory_space<vmem>>, vector<1x16x128xbf16>,
    %c0_34 = arith.constant 0 : index
    %c14_35 = arith.constant 14 : index
    %c0_36 = arith.constant 0 : index
    %30 = vector.load %arg7[%c0_34, %c14_35, %c0_36] : memref<1x32x128xbf16, #tpu.memory_space<vmem>>, vector<1x16x128xbf16>
    %31 = vector.shape_cast %30 : vector<1x16x128xbf16> to vector<16x128xbf16>
    %c1_37 = arith.constant 1 : index
    %c0_38 = arith.constant 0 : index
    %c0_39 = arith.constant 0 : index
    %c0_40 = arith.constant 0 : index
    %32 = vector.load %arg2[%c1_37, %c0_38, %c0_39, %c0_40] : memref<2x3x128x128xbf16, #tpu.memory_space<vmem>>, vector<1x1x128x128xbf16>
    %33 = vector.shape_cast %32 : vector<1x1x128x128xbf16> to vector<128x128xbf16>
    %cst_41 = arith.constant dense<0.000000e+00> : vector<16x128xf32>
    %34 = tpu.matmul %31, %33, %cst_41 {dimension_numbers = #tpu.dot_dimension_numbers<[1], [0], [0], [1], [0, 0, 1, 1], [], []>} : vector<16x128xbf16>, vector<128x128xbf16>, vector<16x128xf32> -> vector<16x128xf32>
    %c0_42 = arith.constant 0 : index
    %c15_43 = arith.constant 15 : index
    %c0_44 = arith.constant 0 : index
    %35 = vector.load %arg7[%c0_42, %c15_43, %c0_44] : memref<1x32x128xbf16, #tpu.memory_space<vmem>>, vector<1x16x128xbf16>
    %36 = vector.shape_cast %35 : vector<1x16x128xbf16> to vector<16x128xbf16>
    %c1_45 = arith.constant 1 : index
    %c1_46 = arith.constant 1 : index
    %c0_47 = arith.constant 0 : index
    %c0_48 = arith.constant 0 : index
    %37 = vector.load %arg2[%c1_45, %c1_46, %c0_47, %c0_48] : memref<2x3x128x128xbf16, #tpu.memory_space<vmem>>, vector<1x1x128x128xbf16>
    %38 = vector.shape_cast %37 : vector<1x1x128x128xbf16> to vector<128x128xbf16>
    %cst_49 = arith.constant dense<0.000000e+00> : vector<16x128xf32>
    %39 = tpu.matmul %36, %38, %cst_49 {dimension_numbers = #tpu.dot_dimension_numbers<[1], [0], [0], [1], [0, 0, 1, 1], [], []>} : vector<16x128xbf16>, vector<128x128xbf16>, vector<16x128xf32> -> vector<16x128xf32>
    %40 = arith.addf %34, %39 : vector<16x128xf32>
    %c0_50 = arith.constant 0 : index
    %c16_51 = arith.constant 16 : index
    %c0_52 = arith.constant 0 : index
    %41 = vector.load %arg7[%c0_50, %c16_51, %c0_52] : memref<1x32x128xbf16, #tpu.memory_space<vmem>>, vector<1x16x128xbf16>
    %42 = vector.shape_cast %41 : vector<1x16x128xbf16> to vector<16x128xbf16>
    %c1_53 = arith.constant 1 : index
    %c2_54 = arith.constant 2 : index
    %c0_55 = arith.constant 0 : index
    %c0_56 = arith.constant 0 : index
    %43 = vector.load %arg2[%c1_53, %c2_54, %c0_55, %c0_56] : memref<2x3x128x128xbf16, #tpu.memory_space<vmem>>, vector<1x1x128x128xbf16>
    %44 = vector.shape_cast %43 : vector<1x1x128x128xbf16> to vector<128x128xbf16>
    %cst_57 = arith.constant dense<0.000000e+00> : vector<16x128xf32>
    %45 = tpu.matmul %42, %44, %cst_57 {dimension_numbers = #tpu.dot_dimension_numbers<[1], [0], [0], [1], [0, 0, 1, 1], [], []>} : vector<16x128xbf16>, vector<128x128xbf16>, vector<16x128xf32> -> vector<16x128xf32>
    %46 = arith.addf %40, %45 : vector<16x128xf32>
    %c1_58 = arith.constant 1 : index
    %c0_59 = arith.constant 0 : index
    %c0_60 = arith.constant 0 : index
    %47 = vector.load %arg3[%c1_58, %c0_59, %c0_60] : memref<2x1x128xf32, #tpu.memory_space<vmem>>, vector<1x1x128xf32>
    %48 = vector.shape_cast %47 : vector<1x1x128xf32> to vector<1x128xf32>
    %49 = vector.broadcast %48 : vector<1x128xf32> to vector<16x128xf32>
    %50 = arith.addf %46, %49 : vector<16x128xf32>
    %cst_61 = arith.constant 0.000000e+00 : f32
    %51 = vector.broadcast %cst_61 : f32 to vector<16x128xf32>
    %52 = arith.maximumf %50, %51 : vector<16x128xf32>
    %53 = arith.truncf %52 : vector<16x128xf32> to vector<16x128xbf16>
    %54 = vector.shape_cast %53 : vector<16x128xbf16> to vector<8x256xbf16>
    %c0_62 = arith.constant 0 : index
    %c0_63 = arith.constant 0 : index
    %55 = vector.load %arg4[%c0_62, %c0_63] : memref<256x128xbf16, #tpu.memory_space<vmem>>, vector<256x128xbf16>
    %cst_64 = arith.constant dense<0.000000e+00> : vector<8x128xf32>
    %56 = tpu.matmul %54, %55, %cst_64 {dimension_numbers = #tpu.dot_dimension_numbers<[1], [0], [0], [1], [0, 0, 1, 1], [], []>} : vector<8x256xbf16>, vector<256x128xbf16>, vector<8x128xf32> -> vector<8x128xf32>
    %c0_65 = arith.constant 0 : index
    %c0_66 = arith.constant 0 : index
    %57 = vector.load %arg5[%c0_65, %c0_66] : memref<1x128xf32, #tpu.memory_space<vmem>>, vector<1x128xf32>
    %58 = vector.broadcast %57 : vector<1x128xf32> to vector<8x128xf32>
    %59 = arith.addf %56, %58 : vector<8x128xf32>
    %60 = vector.shape_cast %59 : vector<8x128xf32> to vector<1x8x128xf32>
    %c0_67 = arith.constant 0 : index
    %c0_68 = arith.constant 0 : index
    %c0_69 = arith.constant 0 : index
    %61 = vector.load %arg6[%c0_67, %c0_68, %c0_69] : memref<1x8x128xf32, #tpu.memory_space<vmem>>, vector<1x8x128xf32>
    tpu.vector_store %arg6[%c0_67, %c0_68, %c0_69], %60 {strides = array<i32>} : memref<1x8x128xf32, #tpu.memory_space<vmem>>, vector<1x8x128xf32>,
    return
  }
  func.func @transform_0(%arg0: i32) -> (i32, i32, i32) {
    %c0_i32 = arith.constant 0 : i32
    %c0_i32_0 = arith.constant 0 : i32
    %c0_i32_1 = arith.constant 0 : i32
    return %arg0, %c0_i32, %c0_i32_0 : i32, i32, i32
  }
  func.func @transform_1(%arg0: i32) -> (i32, i32, i32, i32) {
    %c0_i32 = arith.constant 0 : i32
    %c0_i32_0 = arith.constant 0 : i32
    %c0_i32_1 = arith.constant 0 : i32
    %c0_i32_2 = arith.constant 0 : i32
    %c0_i32_3 = arith.constant 0 : i32
    return %c0_i32, %c0_i32_0, %c0_i32_1, %c0_i32_2 : i32, i32, i32, i32
  }
  func.func @transform_2(%arg0: i32) -> (i32, i32, i32) {
    %c0_i32 = arith.constant 0 : i32
    %c0_i32_0 = arith.constant 0 : i32
    %c0_i32_1 = arith.constant 0 : i32
    %c0_i32_2 = arith.constant 0 : i32
    return %c0_i32, %c0_i32_0, %c0_i32_1 : i32, i32, i32
  }
  func.func @transform_3(%arg0: i32) -> (i32, i32) {
    %c0_i32 = arith.constant 0 : i32
    %c0_i32_0 = arith.constant 0 : i32
    %c0_i32_1 = arith.constant 0 : i32
    return %c0_i32, %c0_i32_0 : i32, i32
  }
  func.func @transform_4(%arg0: i32) -> (i32, i32) {
    %c0_i32 = arith.constant 0 : i32
    %c0_i32_0 = arith.constant 0 : i32
    %c0_i32_1 = arith.constant 0 : i32
    return %c0_i32, %c0_i32_0 : i32, i32
  }
  func.func @transform_5(%arg0: i32) -> (i32, i32, i32) {
    %c0_i32 = arith.constant 0 : i32
    %c0_i32_0 = arith.constant 0 : i32
    %c0_i32_1 = arith.constant 0 : i32
    return %arg0, %c0_i32, %c0_i32_0 : i32, i32, i32
  }
}

</mosaic_0001>

<bundles_post_ra>
// kernel: tpu_custom_call.1
= control target key start
LH: loop header
LB: loop body
LE: loop exit
PB: predicated region body
PF: predicated region fallthrough
CT: control target
= control target key end

     0   :  { %10 = vsyncpa [#allocation4], 0  ;;  %s2221_s0 = inlined_call_operand.hbm [shape: bf16[2,16,128], index: 0, kind: input, shape index: {}]   ;;  %s2222_s1 = inlined_call_operand.hbm [shape: bf16[2,3,128,128], index: 1, kind: input, shape index: {}]   ;;  %s2223_s2 = inlined_call_operand.vmem [shape: f32[2,1,128], index: 2, kind: input, shape index: {}]   ;;  %s2224_s3 = inlined_call_operand.hbm [shape: bf16[256,128], index: 3, kind: input, shape index: {}]   ;;  %s2225_s4 = inlined_call_operand.vmem [shape: f32[1,128], index: 4, kind: input, shape index: {}]   ;;  %s2226_s5 = inlined_call_operand.hbm [shape: f32[2,8,128], index: 5, kind: output, shape index: {}]  }
   0x1   :  { %12 = vsyncpa [#allocation4 + $0x1], 0 }
   0x2   :  { %13 = vsyncpa [#allocation7], 0 }
   0x3   :  { %14 = vsyncpa [#allocation5], 0 }
   0x4   :  { %16 = vsyncpa [#allocation5 + $0x1], 0  ;;  %s1952_s18 = smov 0   ;;  %s1954_s19 = smov 0  }
   0x5   :  { %s1956_s20 = smov 0   ;;  %s1958_s21 = smov 0  }
   0x6 LB: > { %s1973_s22 = sadd.s32 4294967295, %s1911_s21   ;;  %s1318_s23 = sadd.s32 4294967294, %s1911_s21   ;;  %s1911_s21 = sphi %s1958_s21, %s2249_s21   ;;  %s1907_s20 = sphi %s1956_s20, %s2248_s20   ;;  %s1903_s19 = sphi %s1954_s19, %s2247_s19   ;;  %s1899_s18 = sphi %s1952_s18, %s2246_s18  }
   0x7   : > { %p42_p0 = scmp.ne.s32.totalorder %s1903_s19, %s1899_s18  ;;  %p2227_p1 = scmp.eq.s32.totalorder %s1973_s22, 0 }
   0x8   : > { %p150_p2 = scmp.eq.s32.totalorder %s1973_s22, 1  ;;  %p156_p3 = scmp.eq.s32.totalorder %s1318_s23, 1 }
   0x9   : > { %p1982_p4 = por %p2227_p1, %p42_p0  ;;  %p1319_p5 = scmp.ge.s32.totalorder %s1911_s21, 1 }
   0xa   : > { %p1987_p6 = por %p156_p3, %p42_p0  ;;  %p163_p7 = scmp.lt.s32.totalorder %s1911_s21, 3 }
   0xb   : > { %s2232_s24 = scalar_select %p1982_p4, 1, 0 }
   0xc   : > { %s2233_s25 = scalar_select %p1987_p6, 1, 0 }
   0xd   : > { %p1992_p8 = pnand %p1319_p5, %p163_p7  ;;  %s1913_s27 = smov [#allocation6]  }
   0xe   : > { %s175_s28 = sshll.u32 %s1913_s27, 4  ;;  %s1914_s30 = smov [#allocation8]   ;;  %s176_s28 = int_to_ptr.vmem [resolvable:$true] %s175_s28 }
   0xf   : > { %s2234_s26 = scalar_select %p1992_p8, 1, 0 }
  0x10   : > { %p1631_p9 = pneg %p1992_p8  ;;  %s191_s6 = sshll.u32 %s1914_s30, 4  ;;  %s192_s6 = int_to_ptr.vmem [resolvable:$true] %s191_s6 }
  0x11   : > { %s1774_s7 = scalar_lea.vmem %s176_s28, 6144  ;;  %p1782_p5 = scmp.lt.s32.totalorder %s176_s28, %s176_s28 }
  0x12   : > { %p2001_p11 = pnand %p1631_p9, %p2227_p1  ;;  %p1775_p13 = scmp.ne.s32.totalorder %s176_s28, %s1774_s7 }
  0x13   : > { %p1783_p7 = scmp.lt.s32.totalorder %s1774_s7, %s1774_s7 }
  0x14   : > { %p1765_p12 = pneg %p2001_p11 }
  0x15   : > { %p1784_p10 = por %p1783_p7, %p1782_p5 }
  0x16   : > { %p1777_p0 = pnand %p1775_p13, %p1765_p12 }
  0x18   : > { %p1778_p3 = pneg %p1777_p0 }
  0x1a   : > { %p1785_p9 = pnand %p1784_p10, %p1778_p3 }
  0x1c   : > { %1788 = shalt.err (!%p1785_p9)
}
  0x1d   : > { %s2228_s8 = smov 64   ;;  %s1916_s9 = smov 4  }
  0x1e   : > { %1634 = dma.hbm_to_vmem [thread:$0]  (!%p2001_p11), %s2222_s1, 6144, %s176_s28, [#allocation7], %s2228_s8, %s2228_s8, %s1916_s9  }
  0x1f   : > { %s1800_s12 = scalar_lea.vmem %s192_s6, 2048  ;;  %p1808_p10 = scmp.lt.s32.totalorder %s192_s6, %s192_s6 }
  0x20   : > { %p1801_p13 = scmp.ne.s32.totalorder %s192_s6, %s1800_s12  ;;  %p1809_p3 = scmp.lt.s32.totalorder %s1800_s12, %s1800_s12 }
  0x22   : > { %p1803_p0 = pnand %p1801_p13, %p1765_p12  ;;  %p1810_p7 = por %p1809_p3, %p1808_p10 }
  0x24   : > { %p1804_p5 = pneg %p1803_p0 }
  0x26   : > { %p1811_p9 = pnand %p1810_p7, %p1804_p5 }
  0x28   : > { %1814 = shalt.err (!%p1811_p9)
}
  0x29   : > { %1637 = dma.hbm_to_vmem [thread:$0]  (!%p2001_p11), %s2224_s3, 2048, %s192_s6, [#allocation7], %s2228_s8, %s2228_s8, %s1916_s9  }
  0x2a   : > { %s2030_s15 = sadd.s32 1, %s1911_s21   ;;  %s29_s16 = sadd.s32 1, %s1907_s20 }
  0x2b   : > { %s26_s17 = ssub.s32 %s1911_s21, %s2030_s15  ;;  %p36_p12 = scmp.ne.s32.totalorder %s1907_s20, %s1903_s19 }
  0x2c   : > { %p27_p13 = scmp.eq.s32.totalorder %s26_s17, 0  ;;  %p37_p0 = scmp.eq.s32.totalorder %s1911_s21, 0 }
  0x2d   : > { %p2040_p5 = por %p150_p2, %p36_p12  ;;  %p1648_p10 = scmp.lt.s32.totalorder %s1911_s21, 2 }
  0x2e   : > { %s2046_s27 = scalar_select %p27_p13, %s1907_s20, %s29_s16  }
  0x2f   : > { %s2236_s23 = scalar_select %p2040_p5, 1, 0 }
  0x30   : > { %p38_p3 = por %p37_p0, %p36_p12  ;;  %s208_s28 = sand.u32 1, %s1907_s20  }
  0x31   : > { %s1323_s29 = sshll.u32 %s208_s28, 3  ;;  %s1414_s30 = sshll.u32 %s1911_s21, 7 }
  0x32   : > { %s2053_s10 = scalar_lea.hbm %s2221_s0, %s1414_s30  ;;  %s212_s11 = scalar_lea.vmem [#allocation3], %s1323_s29 }
  0x33   : > { %s219_s12 = sshll.u32 %s212_s11, 4  ;;  %p2057_p2 = pnand %p1648_p10, %p38_p3  ;;  %s2055_s12 = int_to_ptr.vmem [resolvable:$true] %s219_s12 }
  0x34   : > { %s2061_s14 = scalar_lea.sflag [#allocation4], %s208_s28  ;;  %s1815_s16 = scalar_lea.hbm %s2053_s10, 128 }
  0x35   : > { %p1816_p11 = scmp.ne.s32.totalorder %s2053_s10, %s1815_s16  ;;  %p1817_p7 = pneg %p2057_p2 }
  0x36   : > { %s1820_s29 = scalar_lea.hbm %s2221_s0, 256  ;;  %p1821_p13 = scmp.lt.s32.totalorder %s2053_s10, %s2221_s0 }
  0x37   : > { %p1818_p9 = pnand %p1817_p7, %p1816_p11  ;;  %p1822_p0 = scmp.lt.s32.totalorder %s1820_s29, %s1815_s16 }
  0x39   : > { %p1819_p12 = pneg %p1818_p9  ;;  %p1823_p10 = por %p1822_p0, %p1821_p13 }
  0x3b   : > { %p1824_p3 = pnand %p1823_p10, %p1819_p12 }
  0x3d   : > { %1827 = shalt.err (!%p1824_p3)
}
  0x3e   : > { %s1828_s28 = scalar_lea.vmem %s2055_s12, 128  ;;  %s1917_s11 = smov [#allocation3]  }
  0x3f   : > { %p1829_p1 = scmp.ne.s32.totalorder %s2055_s12, %s1828_s28  ;;  %s1833_s8 = sshll.u32 %s1917_s11, 4  ;;  %s1834_s8 = int_to_ptr.vmem [resolvable:$false] %s1833_s8 }
  0x40   : > { %s1835_s17 = scalar_lea.vmem %s1834_s8, 256  ;;  %p1836_p9 = scmp.lt.s32.totalorder %s2055_s12, %s1834_s8 }
  0x41   : > { %p1831_p6 = pnand %p1829_p1, %p1817_p7  ;;  %p1837_p5 = scmp.lt.s32.totalorder %s1835_s17, %s1828_s28 }
  0x43   : > { %p1832_p11 = pneg %p1831_p6  ;;  %p1838_p4 = por %p1837_p5, %p1836_p9 }
  0x45   : > { %p1839_p8 = pnand %p1838_p4, %p1832_p11 }
  0x47   : > { %1842 = shalt.err (!%p1839_p8)
}
  0x48   : > { %s2238_s16 = smov 64   ;;  %p2239_p1 = scmp.ne.s32.totalorder %s2234_s26, 0 }
  0x49   : > { %1641 = dma.hbm_to_vmem [thread:$0]  (!%p2057_p2), %s2053_s10, 128, %s2055_s12, %s2061_s14, %s2238_s16, %s2238_s16, %s1916_s9  }
  0x4a   : > { %231 = sbr.rel (%p2239_p1) target bundleno = 826 (0x33a), region = 40  ;;  %s2088_s30 = sand.u32 (!%p2239_p1), 1, %s1903_s19  }
  0x4b   : > { %s1327_s8 = sshll.u32 (!%p2239_p1), %s2088_s30, 3  ;;  %s234_s29 = scalar_lea.sflag (!%p2239_p1), [#allocation4], %s2088_s30 }
  0x4c   : > { %s2094_s13 = scalar_lea.vmem (!%p2239_p1), [#allocation3], %s1327_s8  ;;  %p2240_p4 = scmp.ne.s32.totalorder (!%p2239_p1), %s2232_s24, 0 }
  0x4f   : > { %1886 = dma.done.wait (%p2240_p4), %s234_s29, 128  }
  0x50   : > { %1888 = vsyncadd (%p2240_p4), %s234_s29, 4294967168  ;;  %p2241_p6 = scmp.eq.s32.totalorder %s1973_s22, 0 }
  0x52   : > { %1890 = dma.done.wait (%p2241_p6), [#allocation7], 8192   ;;  %p2242_p8 = pmov %p2241_p6 }
  0x53   : > { %v1918_v0 = vmov 0.0   ;;  %v1919_v1 = vmov 0   ;;  %vm1920_vm0 = vmmov 0   ;;  %v1691_v2 = vld [vmem:[#allocation6 + $0x78] sm:$0xff]   ;;  %v1693_v4 = vld [vmem:[#allocation6 + $0x70] sm:$0xff]   ;;  %v1695_v6 = vld [vmem:[#allocation6 + $0x68] sm:$0xff]  }
  0x54   : > { %1892 = vsyncadd (%p2242_p8), [#allocation7], 4294959104  ;;  %1499 = vmatprep.subr.bf16.mxu0 %v1918_v0  ;;  %1519 = vmatprep.subr.bf16.mxu1 %v1918_v0  ;;  %274 = vst [vmem:[#allocation2 + $0x4] sm:$0xf] %v1919_v1  ;;  %v1692_v3 = vld [vmem:[#allocation6 + $0x38] sm:$0xff]   ;;  %v1694_v5 = vld [vmem:[#allocation6 + $0x30] sm:$0xff]  }
  0x55   : > { %1515 = vmatprep.mubr.msk.bf16.mxu0 %vm1920_vm0, %v1918_v0  ;;  %1535 = vmatprep.mubr.msk.bf16.mxu1 %vm1920_vm0, %v1918_v0  ;;  %v1696_v7 = vld [vmem:[#allocation6 + $0x28] sm:$0xff]   ;;  %v1697_v8 = vld [vmem:[#allocation6 + $0x60] sm:$0xff]   ;;  %v1699_v10 = vld [vmem:[#allocation6 + $0x58] sm:$0xff]   ;;  %vm324_vm1 = vsmask.f32 4352  ;;  %vm435_vm2 = vcmask 1044480  }
  0x56   : > { %1500 = vmatpush3.bf16.msra.mxu0 %v1691_v2  ;;  %1520 = vmatpush3.bf16.msra.mxu1 %v1692_v3  ;;  %v1698_v9 = vld [vmem:[#allocation6 + $0x20] sm:$0xff]   ;;  %v1700_v11 = vld [vmem:[#allocation6 + $0x18] sm:$0xff]   ;;  %v1701_v13 = vld [vmem:[#allocation6 + $0x50] sm:$0xff]   ;;  %s1411_s6 = sshll.u32 %s1973_s22, 7  ;;  %s271_s7 = scalar_lea.vmem [#allocation9], %s1327_s8 }
  0x57   : > { %1501 = vmatprep.subr.bf16.mxu0 %v1918_v0  ;;  %1521 = vmatprep.subr.bf16.mxu1 %v1918_v0  ;;  %v275_v12 = vld [vmem:[%s2094_s13] sm:$0xff]   ;;  %v1703_v15 = vld [vmem:[#allocation6 + $0x48] sm:$0xff]   ;;  %v1705_v18 = vld [vmem:[#allocation6 + $0x40] sm:$0xff]   ;;  %s1229_s28 = sshll.u32 %s271_s7, 4  ;;  %s2184_s16 = scalar_lea.hbm %s2226_s5, %s1411_s6  ;;  %s1230_s28 = int_to_ptr.vmem [resolvable:$true] %s1229_s28 }
  0x58   : > { %277 = vst [vmem:[#allocation2 + $0x8] sm:$0xff] %v275_v12   ;;  %v1702_v14 = vld [vmem:[#allocation6 + $0x10] sm:$0xff]   ;;  %v1704_v17 = vld [vmem:[#allocation6 + $0x8] sm:$0xff]   ;;  %v1706_v21 = vld [vmem:[#allocation6] sm:$0xff]   ;;  %s1216_s29 = scalar_lea.sflag [#allocation5], %s2088_s30  ;;  %s1843_s13 = scalar_lea.vmem %s1230_s28, 128 }
  0x59   : > { %v1710_v35 = vld [vmem:[#allocation6 + $0xb8] sm:$0xff]   ;;  %v1711_v40 = vld [vmem:[#allocation6 + $0xb0] sm:$0xff]   ;;  %v1712_v41 = vld [vmem:[#allocation6 + $0xa8] sm:$0xff]   ;;  %p1844_p5 = scmp.ne.s32.totalorder %s1230_s28, %s1843_s13  ;;  %p2243_p2 = scmp.ne.s32.totalorder %s2236_s23, 0 }
  0x5a   : > { %1502 = vmatpush3.bf16.msra.mxu0 %v1693_v4  ;;  %1522 = vmatpush3.bf16.msra.mxu1 %v1694_v5  ;;  %v1713_v42 = vld [vmem:[#allocation6 + $0xa0] sm:$0xff]   ;;  %v1714_v43 = vld [vmem:[#allocation6 + $0x98] sm:$0xff]   ;;  %v1715_v44 = vld [vmem:[#allocation6 + $0x90] sm:$0xff]   ;;  %s1921_s22 = smov [#allocation9]  }
  0x5b   : > { %1503 = vmatprep.subr.bf16.mxu0 %v1918_v0  ;;  %1523 = vmatprep.subr.bf16.mxu1 %v1918_v0  ;;  %v279_v16 = vld [vmem:[#allocation2 + $0x4] sm:$0x8]  ;;  %v1716_v45 = vld [vmem:[#allocation6 + $0x88] sm:$0xff]   ;;  %v1719_v48 = vld [vmem:[#allocation6 + $0xf8] sm:$0xff]   ;;  %p1845_p7 = pnand %p1844_p5, %p2243_p2  ;;  %s1847_s8 = sshll.u32 %s1921_s22, 4  ;;  %s1848_s8 = int_to_ptr.vmem [resolvable:$false] %s1847_s8 }
  0x5c   : > { %v1717_v46 = vld [vmem:[#allocation6 + $0x80] sm:$0xff]   ;;  %v1720_v49 = vld [vmem:[#allocation6 + $0x138] sm:$0xff]   ;;  %v1721_v50 = vld [vmem:[#allocation6 + $0xf0] sm:$0xff]   ;;  %s1849_s24 = scalar_lea.vmem %s1848_s8, 256  ;;  %p1850_p13 = scmp.lt.s32.totalorder %s1230_s28, %s1848_s8 }
  0x5d   : > { %v1722_v51 = vld [vmem:[#allocation6 + $0x130] sm:$0xff]   ;;  %v1723_v52 = vld [vmem:[#allocation6 + $0xe8] sm:$0xff]   ;;  %v1725_v54 = vld [vmem:[#allocation6 + $0xe0] sm:$0xff]   ;;  %p1846_p12 = pneg %p1845_p7  ;;  %p1851_p0 = scmp.lt.s32.totalorder %s1849_s24, %s1843_s13 }
  0x5e   : > { %1504 = vmatpush3.bf16.msra.mxu0 %v1695_v6  ;;  %1524 = vmatpush3.bf16.msra.mxu1 %v1696_v7  ;;  %v1724_v53 = vld [vmem:[#allocation6 + $0x128] sm:$0xff]   ;;  %v1726_v55 = vld [vmem:[#allocation6 + $0x120] sm:$0xff]   ;;  %v1727_v56 = vld [vmem:[#allocation6 + $0xd8] sm:$0xff]  }
  0x5f   : > { %1505 = vmatprep.subr.bf16.mxu0 %v1918_v0  ;;  %1525 = vmatprep.subr.bf16.mxu1 %v1918_v0  ;;  %v280_v19 = vld [vmem:[#allocation2 + $0x8] sm:$0xf]  ;;  %v298_v20 = vld [vmem:[#allocation2 + $0xc] sm:$0xf]  ;;  %v1728_v57 = vld [vmem:[#allocation6 + $0x118] sm:$0xff]   ;;  %p1852_p10 = por %p1851_p0, %p1850_p13 }
  0x60   : > { %v1331_v22 = vcombine.low %v279_v16, %v280_v19  ;;  %v1332_v23 = vcombine.low %v298_v20, %v298_v20  ;;  %v1709_v24 = vld [vmem:[#allocation2 + $0xc] ss:$0 sps:$4 sm:$0x77]   ;;  %v1350_v47 = vcombine.low %v280_v19, %v298_v20  ;;  %v1729_v58 = vld [vmem:[#allocation6 + $0xd0] sm:$0xff]   ;;  %v1733_v62 = vld [vmem:[#allocation6 + $0xc0] sm:$0xff]  }
  0x61   : > { %v437_v30 = vrot.slane %v1709_v24, 3  ;;  %v1730_v59 = vld [vmem:[#allocation6 + $0x110] sm:$0xff]   ;;  %v1731_v60 = vld [vmem:[#allocation6 + $0xc8] sm:$0xff]   ;;  %v1734_v63 = vld [vmem:[#allocation6 + $0x100] sm:$0xff]   ;;  %p1853_p3 = pnand %p1852_p10, %p1846_p12 }
  0x62   : > { %1506 = vmatpush3.bf16.msra.mxu0 %v1697_v8  ;;  %1526 = vmatpush3.bf16.msra.mxu1 %v1698_v9  ;;  %v326_v25 = vshrl.u32 %v1331_v22, 16  ;;  %v329_v26 = vshll.u32 %v1331_v22, 16  ;;  %v334_v27 = vshrl.u32 %v1332_v23, 16  ;;  %v337_v28 = vshll.u32 %v1332_v23, 16  ;;  %v1732_v61 = vld [vmem:[#allocation6 + $0x108] sm:$0xff]  }
  0x63   : > { %1507 = vmatprep.subr.bf16.mxu0 %v1918_v0  ;;  %1527 = vmatprep.subr.bf16.mxu1 %v1918_v0  ;;  %v436_v29 = vrot.slane %v1331_v22, 3  ;;  %v1359_v12 = vld [vmem:[%s2223_s2] ss:$0 sm:$0xff]  ;;  %v660_v23 = vld [vmem:[#allocation2 + $0x4] sm:$0x8] }
  0x64   : > { %v328_v31 = vrot.slane %v326_v25, 3  ;;  %v331_v32 = vrot.slane %v329_v26, 4  ;;  %v336_v33 = vrot.slane %v334_v27, 3  ;;  %v339_v34 = vrot.slane %v337_v28, 4 }
  0x65   : > { %v438_v38 = vsel %vm435_vm2, %v436_v29, %v437_v30 }
  0x66   : > { %1508 = vmatpush3.bf16.msra.mxu0 %v1699_v10  ;;  %1528 = vmatpush3.bf16.msra.mxu1 %v1700_v11  ;;  %v332_v36 = vor.u32 %v331_v32, %v328_v31  ;;  %v340_v37 = vor.u32 %v339_v34, %v336_v33 }
  0x67   : > { %1509 = vmatprep.subr.bf16.mxu0 %v1918_v0  ;;  %1529 = vmatprep.subr.bf16.mxu1 %v1918_v0 }
  0x68   : > { %v341_v39 = vsel %vm324_vm1, %v332_v36, %v340_v37 }
  0x6a   : > { %1510 = vmatpush3.bf16.msra.mxu0 %v1701_v13  ;;  %1530 = vmatpush3.bf16.msra.mxu1 %v1702_v14 }
  0x6b   : > { %1511 = vmatprep.subr.bf16.mxu0 %v1918_v0  ;;  %1531 = vmatprep.subr.bf16.mxu1 %v1918_v0 }
  0x6e   : > { %1512 = vmatpush3.bf16.msra.mxu0 %v1703_v15  ;;  %1532 = vmatpush3.bf16.msra.mxu1 %v1704_v17 }
  0x6f   : > { %1513 = vmatprep.subr.bf16.mxu0 %v1918_v0  ;;  %1533 = vmatprep.subr.bf16.mxu1 %v1918_v0 }
  0x72   : > { %1514 = vmatpush3.bf16.msra.mxu0 %v1705_v18  ;;  %1534 = vmatpush3.bf16.msra.mxu1 %v1706_v21 }
  0x73   : > { %1539 = vmatprep.subr.bf16.mxu0 %v1918_v0  ;;  %1559 = vmatprep.subr.bf16.mxu1 %v1918_v0 }
  0x75   : > { %1516 = vmatmul.mubr.bf16.vlgmr.msra.gmra.mxu0 %v341_v39  ;;  %1536 = vmatmul.mubr.bf16.vlgmr.msra.gmra.mxu1 %v438_v38 }
  0x76   : > { %1540 = vmatpush3.bf16.msra.mxu0 %v1710_v35  ;;  %1555 = vmatprep.mubr.msk.bf16.mxu0 %vm1920_vm0, %v1918_v0 }
  0x77   : > { %1541 = vmatprep.subr.bf16.mxu0 %v1918_v0  ;;  %1575 = vmatprep.mubr.msk.bf16.mxu1 %vm1920_vm0, %v1918_v0 }
  0x78   : > { %1560 = vmatpush3.bf16.msra.mxu1 %v1720_v49  ;;  %v1744_v49 = vld [vmem:[#allocation6 + $0x148] sm:$0xff]  }
  0x79   : > { %1561 = vmatprep.subr.bf16.mxu1 %v1918_v0 }
  0x7a   : > { %1542 = vmatpush3.bf16.msra.mxu0 %v1711_v40 }
  0x7b   : > { %1543 = vmatprep.subr.bf16.mxu0 %v1918_v0 }
  0x7c   : > { %1562 = vmatpush3.bf16.msra.mxu1 %v1722_v51 }
  0x7d   : > { %1563 = vmatprep.subr.bf16.mxu1 %v1918_v0 }
  0x7e   : > { %1544 = vmatpush3.bf16.msra.mxu0 %v1712_v41 }
  0x7f   : > { %1545 = vmatprep.subr.bf16.mxu0 %v1918_v0 }
  0x80   : > { %1564 = vmatpush3.bf16.msra.mxu1 %v1724_v53  ;;  %v1748_v53 = vld [vmem:[#allocation8 + $0x38] sm:$0xff]  }
  0x81   : > { %1565 = vmatprep.subr.bf16.mxu1 %v1918_v0 }
  0x82   : > { %1546 = vmatpush3.bf16.msra.mxu0 %v1713_v42  ;;  %v1738_v42 = vld [vmem:[#allocation6 + $0x178] sm:$0xff]  }
  0x83   : > { %1547 = vmatprep.subr.bf16.mxu0 %v1918_v0 }
  0x84   : > { %1566 = vmatpush3.bf16.msra.mxu1 %v1726_v55  ;;  %v1750_v55 = vld [vmem:[#allocation8 + $0x30] sm:$0xff]  }
  0x85   : > { %1567 = vmatprep.subr.bf16.mxu1 %v1918_v0 }
  0x86   : > { %1548 = vmatpush3.bf16.msra.mxu0 %v1714_v43 }
  0x87   : > { %1549 = vmatprep.subr.bf16.mxu0 %v1918_v0 }
  0x88   : > { %1568 = vmatpush3.bf16.msra.mxu1 %v1728_v57  ;;  %v1752_v57 = vld [vmem:[#allocation8 + $0x28] sm:$0xff]  }
  0x89   : > { %1569 = vmatprep.subr.bf16.mxu1 %v1918_v0 }
  0x8a   : > { %1550 = vmatpush3.bf16.msra.mxu0 %v1715_v44  ;;  %v1739_v44 = vld [vmem:[#allocation6 + $0x170] sm:$0xff]  }
  0x8b   : > { %1551 = vmatprep.subr.bf16.mxu0 %v1918_v0 }
  0x8c   : > { %1570 = vmatpush3.bf16.msra.mxu1 %v1730_v59  ;;  %v1754_v59 = vld [vmem:[#allocation8 + $0x20] sm:$0xff]  }
  0x8d   : > { %1571 = vmatprep.subr.bf16.mxu1 %v1918_v0 }
  0x8e   : > { %1552 = vmatpush3.bf16.msra.mxu0 %v1716_v45  ;;  %v1740_v45 = vld [vmem:[#allocation6 + $0x168] sm:$0xff]  }
  0x8f   : > { %1553 = vmatprep.subr.bf16.mxu0 %v1918_v0 }
  0x90   : > { %1572 = vmatpush3.bf16.msra.mxu1 %v1732_v61  ;;  %v1757_v61 = vld [vmem:[#allocation8 + $0x50] sm:$0xff]  }
  0x91   : > { %1573 = vmatprep.subr.bf16.mxu1 %v1918_v0 }
  0x92   : > { %1554 = vmatpush3.bf16.msra.mxu0 %v1717_v46  ;;  %v1741_v46 = vld [vmem:[#allocation6 + $0x160] sm:$0xff]  }
  0x93   : > { %1579 = vmatprep.subr.bf16.mxu0 %v1918_v0 }
  0x94   : > { %1574 = vmatpush3.bf16.msra.mxu1 %v1734_v63  ;;  %v1759_v63 = vld [vmem:[#allocation8 + $0x48] sm:$0xff]  }
  0x95   : > { %1556 = vmatmul.mubr.bf16.vlgmr.msra.gmra.mxu0 %v1350_v47  ;;  %1599 = vmatprep.subr.bf16.mxu1 %v1918_v0  ;;  %v1742_v47 = vld [vmem:[#allocation6 + $0x158] sm:$0xff]  }
  0x96   : > { %1595 = vmatprep.mubr.msk.bf16.mxu0 %vm1920_vm0, %v1918_v0  ;;  %1580 = vmatpush3.bf16.msra.mxu0 %v1719_v48  ;;  %v1743_v48 = vld [vmem:[#allocation6 + $0x150] sm:$0xff]  }
  0x97   : > { %1581 = vmatprep.subr.bf16.mxu0 %v1918_v0 }
  0x9a   : > { %1582 = vmatpush3.bf16.msra.mxu0 %v1721_v50  ;;  %v1745_v50 = vld [vmem:[#allocation6 + $0x140] sm:$0xff]  }
  0x9b   : > { %1583 = vmatprep.subr.bf16.mxu0 %v1918_v0 }
  0x9e   : > { %1584 = vmatpush3.bf16.msra.mxu0 %v1723_v52  ;;  %v1747_v52 = vld [vmem:[#allocation8 + $0x78] sm:$0xff]  }
  0x9f   : > { %1585 = vmatprep.subr.bf16.mxu0 %v1918_v0 }
  0xa2   : > { %1586 = vmatpush3.bf16.msra.mxu0 %v1725_v54  ;;  %v1749_v54 = vld [vmem:[#allocation8 + $0x70] sm:$0xff]  }
  0xa3   : > { %1587 = vmatprep.subr.bf16.mxu0 %v1918_v0 }
  0xa6   : > { %1588 = vmatpush3.bf16.msra.mxu0 %v1727_v56  ;;  %v1751_v56 = vld [vmem:[#allocation8 + $0x68] sm:$0xff]  }
  0xa7   : > { %1589 = vmatprep.subr.bf16.mxu0 %v1918_v0 }
  0xaa   : > { %1590 = vmatpush3.bf16.msra.mxu0 %v1729_v58  ;;  %v1753_v58 = vld [vmem:[#allocation8 + $0x60] sm:$0xff]  }
  0xab   : > { %1591 = vmatprep.subr.bf16.mxu0 %v1918_v0 }
  0xae   : > { %1592 = vmatpush3.bf16.msra.mxu0 %v1731_v60  ;;  %v1756_v60 = vld [vmem:[#allocation8 + $0x18] sm:$0xff]  }
  0xaf   : > { %1593 = vmatprep.subr.bf16.mxu0 %v1918_v0 }
  0xb2   : > { %1594 = vmatpush3.bf16.msra.mxu0 %v1733_v62  ;;  %v1758_v62 = vld [vmem:[#allocation8 + $0x10] sm:$0xff]  }
  0xb3   : > { %1477 = vmatprep.subr.bf16.mxu0 %v1747_v52 }
 0x135   : > { %v425_v1 = vpop.f32.mrf.mxu0  ;;  %v522_v2 = vpop.f32.mrf.mxu1 }
 0x136   : > { %v523_v9 = vadd.f32 %v522_v2, %v425_v1  ;;  %v1760_v1 = vld [vmem:[#allocation8 + $0x8] sm:$0xff]   ;;  %v1761_v2 = vld [vmem:[#allocation8 + $0x40] sm:$0xff]  }
 0x137   : > { %v1517_v3 = vpop.f32.mrf.mxu0  ;;  %v1537_v4 = vpop.f32.mrf.mxu1 }
 0x138   : > { %v1762_v3 = vld [vmem:[#allocation8] sm:$0xff]  }
 0x139   : > { %v428_v5 = vpop.f32.mrf.mxu0  ;;  %v525_v6 = vpop.f32.mrf.mxu1 }
 0x13a   : > { %v526_v14 = vadd.f32 %v525_v6, %v428_v5 }
 0x13b   : > { %v1518_v7 = vpop.f32.mrf.mxu0  ;;  %v1538_v8 = vpop.f32.mrf.mxu1 }
 0x155   : > { %v630_v10 = vpop.f32.mrf.mxu0 }
 0x156   : > { %v637_v11 = vadd.f32 %v630_v10, %v523_v9 }
 0x157   : > { %v1557_v13 = vpop.f32.mrf.mxu0 }
 0x158   : > { %v646_v16 = vadd.f32 %v1359_v12, %v637_v11 }
 0x159   : > { %v633_v15 = vpop.f32.mrf.mxu0 }
 0x15a   : > { %v638_v17 = vadd.f32 %v633_v15, %v526_v14  ;;  %v648_v20 = vmax.f32 %v646_v16, 0.0  ;;  %v1391_v15 = vld [vmem:[%s2223_s2 + $0x1] ss:$0 sm:$0xff] }
 0x15b   : > { %v1558_v18 = vpop.f32.mrf.mxu0 }
 0x15c   : > { %v647_v19 = vadd.f32 %v1359_v12, %v638_v17 }
 0x15e   : > { %v649_v21 = vmax.f32 %v647_v19, 0.0 }
 0x160   : > { %v1420_v22 = vpack.c.bf16 %v649_v21, %v648_v20 }
 0x162   : > { %1422 = vst [vmem:[#allocation2 + $0x8] sm:$0xff] %v1420_v22  }
 0x169   : > { %v661_v24 = vld [vmem:[#allocation2 + $0x8] sm:$0xf]  ;;  %v680_v25 = vld [vmem:[#allocation2 + $0xc] sm:$0xf] }
 0x16a   : > { %v1362_v26 = vcombine.low %v660_v23, %v661_v24  ;;  %v1736_v27 = vld [vmem:[#allocation2 + $0xc] ss:$0 sps:$4 sm:$0x77]   ;;  %v1363_v28 = vcombine.low %v680_v25, %v680_v25  ;;  %v1381_v51 = vcombine.low %v661_v24, %v680_v25 }
 0x16b   : > { %v817_v30 = vrot.slane %v1736_v27, 3 }
 0x16c   : > { %v816_v29 = vrot.slane %v1362_v26, 3  ;;  %v707_v31 = vshrl.u32 %v1362_v26, 16  ;;  %v710_v32 = vshll.u32 %v1362_v26, 16  ;;  %v715_v33 = vshrl.u32 %v1363_v28, 16 }
 0x16d   : > { %v718_v34 = vshll.u32 %v1363_v28, 16 }
 0x16e   : > { %v818_v35 = vsel %vm435_vm2, %v816_v29, %v817_v30  ;;  %v709_v36 = vrot.slane %v707_v31, 3  ;;  %v712_v37 = vrot.slane %v710_v32, 4  ;;  %v717_v38 = vrot.slane %v715_v33, 3  ;;  %v1392_v30 = vld [vmem:[%s2225_s4] ss:$0 sm:$0xff] }
 0x16f   : > { %1596 = vmatmul.mubr.bf16.vlgmr.msra.gmra.mxu0 %v818_v35  ;;  %v720_v39 = vrot.slane %v718_v34, 4 }
 0x170   : > { %v713_v40 = vor.u32 %v712_v37, %v709_v36  ;;  %1478 = vmatpush3.bf16.msra.mxu0 %v1748_v53 }
 0x171   : > { %v721_v41 = vor.u32 %v720_v39, %v717_v38  ;;  %1479 = vmatprep.subr.bf16.mxu0 %v1749_v54 }
 0x173   : > { %v722_v43 = vsel %vm324_vm1, %v713_v40, %v721_v41 }
 0x174   : > { %1576 = vmatmul.mubr.bf16.vlgmr.msra.gmra.mxu1 %v722_v43  ;;  %1480 = vmatpush3.bf16.msra.mxu0 %v1750_v55 }
 0x175   : > { %1600 = vmatpush3.bf16.msra.mxu1 %v1738_v42  ;;  %1615 = vmatprep.mubr.msk.bf16.mxu1 %vm1920_vm0, %v1918_v0 }
 0x176   : > { %1601 = vmatprep.subr.bf16.mxu1 %v1918_v0  ;;  %1481 = vmatprep.subr.bf16.mxu0 %v1751_v56 }
 0x178   : > { %1482 = vmatpush3.bf16.msra.mxu0 %v1752_v57 }
 0x179   : > { %1602 = vmatpush3.bf16.msra.mxu1 %v1739_v44  ;;  %1483 = vmatprep.subr.bf16.mxu0 %v1753_v58 }
 0x17a   : > { %1603 = vmatprep.subr.bf16.mxu1 %v1918_v0 }
 0x17c   : > { %1484 = vmatpush3.bf16.msra.mxu0 %v1754_v59 }
 0x17d   : > { %1604 = vmatpush3.bf16.msra.mxu1 %v1740_v45 }
 0x17e   : > { %1605 = vmatprep.subr.bf16.mxu1 %v1918_v0 }
 0x181   : > { %1606 = vmatpush3.bf16.msra.mxu1 %v1741_v46 }
 0x182   : > { %1607 = vmatprep.subr.bf16.mxu1 %v1918_v0 }
 0x185   : > { %1608 = vmatpush3.bf16.msra.mxu1 %v1742_v47 }
 0x186   : > { %1609 = vmatprep.subr.bf16.mxu1 %v1918_v0 }
 0x189   : > { %1610 = vmatpush3.bf16.msra.mxu1 %v1743_v48 }
 0x18a   : > { %1611 = vmatprep.subr.bf16.mxu1 %v1918_v0 }
 0x18d   : > { %1612 = vmatpush3.bf16.msra.mxu1 %v1744_v49 }
 0x18e   : > { %1613 = vmatprep.subr.bf16.mxu1 %v1918_v0  ;;  %v1755_v0 = vld [vmem:[#allocation8 + $0x58] sm:$0xff]  }
 0x18f   : > { %1485 = vmatprep.subr.bf16.mxu0 %v1755_v0 }
 0x190   : > { %1486 = vmatpush3.bf16.msra.mxu0 %v1756_v60 }
 0x191   : > { %1614 = vmatpush3.bf16.msra.mxu1 %v1745_v50  ;;  %1487 = vmatprep.subr.bf16.mxu0 %v1757_v61 }
 0x194   : > { %1616 = vmatmul.mubr.bf16.vlgmr.msra.gmra.mxu1 %v1381_v51  ;;  %1488 = vmatpush3.bf16.msra.mxu0 %v1758_v62 }
 0x195   : > { %1489 = vmatprep.subr.bf16.mxu0 %v1759_v63 }
 0x198   : > { %1490 = vmatpush3.bf16.msra.mxu0 %v1760_v1 }
 0x199   : > { %1491 = vmatprep.subr.bf16.mxu0 %v1761_v2 }
 0x19c   : > { %1492 = vmatpush3.bf16.msra.mxu0 %v1762_v3 }
 0x22f   : > { %v902_v4 = vpop.f32.mrf.mxu0 }
 0x231   : > { %v1597_v5 = vpop.f32.mrf.mxu0 }
 0x233   : > { %v905_v6 = vpop.f32.mrf.mxu0 }
 0x234   : > { %v806_v7 = vpop.f32.mrf.mxu1 }
 0x235   : > { %v1598_v8 = vpop.f32.mrf.mxu0  ;;  %v903_v12 = vadd.f32 %v902_v4, %v806_v7 }
 0x236   : > { %v1577_v9 = vpop.f32.mrf.mxu1 }
 0x238   : > { %v809_v10 = vpop.f32.mrf.mxu1 }
 0x239   : > { %v906_v17 = vadd.f32 %v905_v6, %v809_v10 }
 0x23a   : > { %v1578_v11 = vpop.f32.mrf.mxu1 }
 0x254   : > { %v1010_v13 = vpop.f32.mrf.mxu1 }
 0x255   : > { %v1017_v14 = vadd.f32 %v1010_v13, %v903_v12 }
 0x256   : > { %v1617_v16 = vpop.f32.mrf.mxu1 }
 0x257   : > { %v1027_v19 = vadd.f32 %v1391_v15, %v1017_v14 }
 0x258   : > { %v1013_v18 = vpop.f32.mrf.mxu1 }
 0x259   : > { %v1018_v20 = vadd.f32 %v1013_v18, %v906_v17  ;;  %v1029_v23 = vmax.f32 %v1027_v19, 0.0 }
 0x25a   : > { %v1618_v21 = vpop.f32.mrf.mxu1 }
 0x25b   : > { %v1028_v22 = vadd.f32 %v1391_v15, %v1018_v20 }
 0x25d   : > { %v1030_v24 = vmax.f32 %v1028_v22, 0.0 }
 0x25f   : > { %v1031_v25 = vpack.c.bf16 %v1030_v24, %v1029_v23 }
 0x261   : > { %v1034_v26 = vunpack.i.h.s16 %v1031_v25  ;;  %v1393_v28 = vpack.c.b16 %v1031_v25, %v1031_v25 }
 0x263   : > { %v1075_v27 = vpack.c.b16 %v1034_v26, %v1034_v26 }
 0x265   : > { %1206 = vmatprep.mubr.bf16.mxu0 %v1075_v27 }
 0x266   : > { %1207 = vmatmul.mubr.bf16.vlgmr.msra.gmra.mxu0 %v1393_v28 }
 0x326   : > { %v1493_v29 = vpop.f32.mrf.mxu0 }
 0x328   : > { %v1494_v31 = vpop.f32.mrf.mxu0 }
 0x329   : > { %v1495_v32 = vadd.f32 %v1494_v31, %v1493_v29 }
 0x32a   : > { %v1496_v33 = vpop.f32.mrf.mxu0 }
 0x32b   : > { %v1209_v34 = vadd.f32 %v1495_v32, %v1392_v30 }
 0x32c   : > { %v1497_v35 = vpop.f32.mrf.mxu0 }
 0x32d   : > { %1214 = vst [vmem:[%s271_s7] sm:$0xff] %v1209_v34 }
 0x32e   : > { %1856 = shalt.err (!%p1853_p3)
}
 0x32f   : > { %s1857_s26 = scalar_lea.hbm %s2184_s16, 128  ;;  %s1861_s10 = scalar_lea.hbm %s2226_s5, 256 }
 0x330   : > { %p1858_p11 = scmp.ne.s32.totalorder %s2184_s16, %s1857_s26  ;;  %p1862_p4 = scmp.lt.s32.totalorder %s2184_s16, %s2226_s5 }
 0x331   : > { %p1863_p6 = scmp.lt.s32.totalorder %s1861_s10, %s1857_s26 }
 0x332   : > { %p1859_p9 = pnand %p1858_p11, %p2243_p2 }
 0x333   : > { %p1864_p8 = por %p1863_p6, %p1862_p4 }
 0x334   : > { %p1860_p1 = pneg %p1859_p9 }
 0x336   : > { %p1865_p5 = pnand %p1864_p8, %p1860_p1 }
 0x338   : > { %1868 = shalt.err (!%p1865_p5)
}
 0x339   : > { %1629 = dma.vmem_to_hbm [thread:$0]  (%p2243_p2), %s1230_s28, 128, %s2184_s16, %s1216_s29  }
 0x33a PF: > { %s1241_s6 = sand.u32 1, %s1899_s18   ;;  %p2244_p7 = scmp.ne.s32.totalorder %s2233_s25, 0 }
 0x33b   : > { %p2245_p12 = scmp.ge.s32.totalorder %s1911_s21, 2  ;;  %s1242_s7 = scalar_lea.sflag [#allocation5], %s1241_s6 }
 0x33d   : > { %p1643_p13 = pnand %p2245_p12, %p2244_p7 }
 0x33f   : > { %p1644_p0 = pneg %p1643_p13 }
 0x341   : > { %1894 = dma.done.wait (%p1644_p0), %s1242_s7, 128  }
 0x342   : > { %1896 = vsyncadd (%p1644_p0), %s1242_s7, 4294967168  ;;  %p19_p10 = scmp.ge.s32.totalorder %s2030_s15, 4   ;;  %s2246_s18 = smov %s1903_s19 }
 0x343   : > { %s2247_s19 = smov %s1907_s20  ;;  %s2248_s20 = smov %s2046_s27 }
 0x344   : > { %s2249_s21 = smov %s2030_s15  ;;  %21 = sbr.rel (!%p19_p10) target bundleno = 6 (0x6), region = 99 }
 0x349   :  { %1247 = vsyncpa [#allocation4], 1 }
 0x34a   :  { %1249 = vsyncpa [#allocation4 + $0x1], 1 }
 0x34b   :  { %1250 = vsyncpa [#allocation7], 1 }
 0x34c   :  { %1251 = vsyncpa [#allocation5], 1 }
 0x34d   :  { %1253 = vsyncpa [#allocation5 + $0x1], 1 }

// kernel: tpu_custom_call.1
= control target key start
LH: loop header
LB: loop body
LE: loop exit
PB: predicated region body
PF: predicated region fallthrough
CT: control target
= control target key end

     0   :  { %10 = vsyncpa [#allocation4], 0  ;;  %s2221_s0 = inlined_call_operand.hbm [shape: bf16[2,16,128], index: 0, kind: input, shape index: {}]   ;;  %s2222_s1 = inlined_call_operand.hbm [shape: bf16[2,3,128,128], index: 1, kind: input, shape index: {}]   ;;  %s2223_s2 = inlined_call_operand.vmem [shape: f32[2,1,128], index: 2, kind: input, shape index: {}]   ;;  %s2224_s3 = inlined_call_operand.hbm [shape: bf16[256,128], index: 3, kind: input, shape index: {}]   ;;  %s2225_s4 = inlined_call_operand.vmem [shape: f32[1,128], index: 4, kind: input, shape index: {}]   ;;  %s2226_s5 = inlined_call_operand.hbm [shape: f32[2,8,128], index: 5, kind: output, shape index: {}]  }
   0x1   :  { %12 = vsyncpa [#allocation4 + $0x1], 0 }
   0x2   :  { %13 = vsyncpa [#allocation7], 0 }
   0x3   :  { %14 = vsyncpa [#allocation5], 0 }
   0x4   :  { %16 = vsyncpa [#allocation5 + $0x1], 0  ;;  %s1952_s18 = smov 0   ;;  %s1954_s19 = smov 0  }
   0x5   :  { %s1956_s20 = smov 0   ;;  %s1958_s21 = smov 0  }
   0x6 LB: > { %s1973_s22 = sadd.s32 4294967295, %s1911_s21   ;;  %s1318_s23 = sadd.s32 4294967294, %s1911_s21   ;;  %s1911_s21 = sphi %s1958_s21, %s2249_s21   ;;  %s1907_s20 = sphi %s1956_s20, %s2248_s20   ;;  %s1903_s19 = sphi %s1954_s19, %s2247_s19   ;;  %s1899_s18 = sphi %s1952_s18, %s2246_s18  }
   0x7   : > { %p42_p0 = scmp.ne.s32.totalorder %s1903_s19, %s1899_s18  ;;  %p2227_p1 = scmp.eq.s32.totalorder %s1973_s22, 0 }
   0x8   : > { %p150_p2 = scmp.eq.s32.totalorder %s1973_s22, 1  ;;  %p156_p3 = scmp.eq.s32.totalorder %s1318_s23, 1 }
   0x9   : > { %p1982_p4 = por %p2227_p1, %p42_p0  ;;  %p1319_p5 = scmp.ge.s32.totalorder %s1911_s21, 1 }
   0xa   : > { %p1987_p6 = por %p156_p3, %p42_p0  ;;  %p163_p7 = scmp.lt.s32.totalorder %s1911_s21, 3 }
   0xb   : > { %s2232_s24 = scalar_select %p1982_p4, 1, 0 }
   0xc   : > { %s2233_s25 = scalar_select %p1987_p6, 1, 0 }
   0xd   : > { %p1992_p8 = pnand %p1319_p5, %p163_p7  ;;  %s1913_s27 = smov [#allocation6]  }
   0xe   : > { %s175_s28 = sshll.u32 %s1913_s27, 4  ;;  %s1914_s30 = smov [#allocation8]   ;;  %s176_s28 = int_to_ptr.vmem [resolvable:$true] %s175_s28 }
   0xf   : > { %s2234_s26 = scalar_select %p1992_p8, 1, 0 }
  0x10   : > { %p1631_p9 = pneg %p1992_p8  ;;  %s191_s6 = sshll.u32 %s1914_s30, 4  ;;  %s192_s6 = int_to_ptr.vmem [resolvable:$true] %s191_s6 }
  0x11   : > { %s1774_s7 = scalar_lea.vmem %s176_s28, 6144  ;;  %p1782_p5 = scmp.lt.s32.totalorder %s176_s28, %s176_s28 }
  0x12   : > { %p2001_p11 = pnand %p1631_p9, %p2227_p1  ;;  %p1775_p13 = scmp.ne.s32.totalorder %s176_s28, %s1774_s7 }
  0x13   : > { %p1783_p7 = scmp.lt.s32.totalorder %s1774_s7, %s1774_s7 }
  0x14   : > { %p1765_p12 = pneg %p2001_p11 }
  0x15   : > { %p1784_p10 = por %p1783_p7, %p1782_p5 }
  0x16   : > { %p1777_p0 = pnand %p1775_p13, %p1765_p12 }
  0x18   : > { %p1778_p3 = pneg %p1777_p0 }
  0x1a   : > { %p1785_p9 = pnand %p1784_p10, %p1778_p3 }
  0x1c   : > { %1788 = shalt.err (!%p1785_p9)
}
  0x1d   : > { %s2228_s8 = smov 64   ;;  %s1916_s9 = smov 4  }
  0x1e   : > { %1634 = dma.hbm_to_vmem [thread:$0]  (!%p2001_p11), %s2222_s1, 6144, %s176_s28, [#allocation7], %s2228_s8, %s2228_s8, %s1916_s9  }
  0x1f   : > { %s1800_s12 = scalar_lea.vmem %s192_s6, 2048  ;;  %p1808_p10 = scmp.lt.s32.totalorder %s192_s6, %s192_s6 }
  0x20   : > { %p1801_p13 = scmp.ne.s32.totalorder %s192_s6, %s1800_s12  ;;  %p1809_p3 = scmp.lt.s32.totalorder %s1800_s12, %s1800_s12 }
  0x22   : > { %p1803_p0 = pnand %p1801_p13, %p1765_p12  ;;  %p1810_p7 = por %p1809_p3, %p1808_p10 }
  0x24   : > { %p1804_p5 = pneg %p1803_p0 }
  0x26   : > { %p1811_p9 = pnand %p1810_p7, %p1804_p5 }
  0x28   : > { %1814 = shalt.err (!%p1811_p9)
}
  0x29   : > { %1637 = dma.hbm_to_vmem [thread:$0]  (!%p2001_p11), %s2224_s3, 2048, %s192_s6, [#allocation7], %s2228_s8, %s2228_s8, %s1916_s9  }
  0x2a   : > { %s2030_s15 = sadd.s32 1, %s1911_s21   ;;  %s29_s16 = sadd.s32 1, %s1907_s20 }
  0x2b   : > { %s26_s17 = ssub.s32 %s1911_s21, %s2030_s15  ;;  %p36_p12 = scmp.ne.s32.totalorder %s1907_s20, %s1903_s19 }
  0x2c   : > { %p27_p13 = scmp.eq.s32.totalorder %s26_s17, 0  ;;  %p37_p0 = scmp.eq.s32.totalorder %s1911_s21, 0 }
  0x2d   : > { %p2040_p5 = por %p150_p2, %p36_p12  ;;  %p1648_p10 = scmp.lt.s32.totalorder %s1911_s21, 2 }
  0x2e   : > { %s2046_s27 = scalar_select %p27_p13, %s1907_s20, %s29_s16  }
  0x2f   : > { %s2236_s23 = scalar_select %p2040_p5, 1, 0 }
  0x30   : > { %p38_p3 = por %p37_p0, %p36_p12  ;;  %s208_s28 = sand.u32 1, %s1907_s20  }
  0x31   : > { %s1323_s29 = sshll.u32 %s208_s28, 3  ;;  %s1414_s30 = sshll.u32 %s1911_s21, 7 }
  0x32   : > { %s2053_s10 = scalar_lea.hbm %s2221_s0, %s1414_s30  ;;  %s212_s11 = scalar_lea.vmem [#allocation3], %s1323_s29 }
  0x33   : > { %s219_s12 = sshll.u32 %s212_s11, 4  ;;  %p2057_p2 = pnand %p1648_p10, %p38_p3  ;;  %s2055_s12 = int_to_ptr.vmem [resolvable:$true] %s219_s12 }
  0x34   : > { %s2061_s14 = scalar_lea.sflag [#allocation4], %s208_s28  ;;  %s1815_s16 = scalar_lea.hbm %s2053_s10, 128 }
  0x35   : > { %p1816_p11 = scmp.ne.s32.totalorder %s2053_s10, %s1815_s16  ;;  %p1817_p7 = pneg %p2057_p2 }
  0x36   : > { %s1820_s29 = scalar_lea.hbm %s2221_s0, 256  ;;  %p1821_p13 = scmp.lt.s32.totalorder %s2053_s10, %s2221_s0 }
  0x37   : > { %p1818_p9 = pnand %p1817_p7, %p1816_p11  ;;  %p1822_p0 = scmp.lt.s32.totalorder %s1820_s29, %s1815_s16 }
  0x39   : > { %p1819_p12 = pneg %p1818_p9  ;;  %p1823_p10 = por %p1822_p0, %p1821_p13 }
  0x3b   : > { %p1824_p3 = pnand %p1823_p10, %p1819_p12 }
  0x3d   : > { %1827 = shalt.err (!%p1824_p3)
}
  0x3e   : > { %s1828_s28 = scalar_lea.vmem %s2055_s12, 128  ;;  %s1917_s11 = smov [#allocation3]  }
  0x3f   : > { %p1829_p1 = scmp.ne.s32.totalorder %s2055_s12, %s1828_s28  ;;  %s1833_s8 = sshll.u32 %s1917_s11, 4  ;;  %s1834_s8 = int_to_ptr.vmem [resolvable:$false] %s1833_s8 }
  0x40   : > { %s1835_s17 = scalar_lea.vmem %s1834_s8, 256  ;;  %p1836_p9 = scmp.lt.s32.totalorder %s2055_s12, %s1834_s8 }
  0x41   : > { %p1831_p6 = pnand %p1829_p1, %p1817_p7  ;;  %p1837_p5 = scmp.lt.s32.totalorder %s1835_s17, %s1828_s28 }
  0x43   : > { %p1832_p11 = pneg %p1831_p6  ;;  %p1838_p4 = por %p1837_p5, %p1836_p9 }
  0x45   : > { %p1839_p8 = pnand %p1838_p4, %p1832_p11 }
  0x47   : > { %1842 = shalt.err (!%p1839_p8)
}
  0x48   : > { %s2238_s16 = smov 64   ;;  %p2239_p1 = scmp.ne.s32.totalorder %s2234_s26, 0 }
  0x49   : > { %1641 = dma.hbm_to_vmem [thread:$0]  (!%p2057_p2), %s2053_s10, 128, %s2055_s12, %s2061_s14, %s2238_s16, %s2238_s16, %s1916_s9  }
  0x4a   : > { %231 = sbr.rel (%p2239_p1) target bundleno = 826 (0x33a), region = 40  ;;  %s2088_s30 = sand.u32 (!%p2239_p1), 1, %s1903_s19  }
  0x4b   : > { %s1327_s8 = sshll.u32 (!%p2239_p1), %s2088_s30, 3  ;;  %s234_s29 = scalar_lea.sflag (!%p2239_p1), [#allocation4], %s2088_s30 }
  0x4c   : > { %s2094_s13 = scalar_lea.vmem (!%p2239_p1), [#allocation3], %s1327_s8  ;;  %p2240_p4 = scmp.ne.s32.totalorder (!%p2239_p1), %s2232_s24, 0 }
  0x4f   : > { %1886 = dma.done.wait (%p2240_p4), %s234_s29, 128  }
  0x50   : > { %1888 = vsyncadd (%p2240_p4), %s234_s29, 4294967168  ;;  %p2241_p6 = scmp.eq.s32.totalorder %s1973_s22, 0 }
  0x52   : > { %1890 = dma.done.wait (%p2241_p6), [#allocation7], 8192   ;;  %p2242_p8 = pmov %p2241_p6 }
  0x53   : > { %v1918_v0 = vmov 0.0   ;;  %v1919_v1 = vmov 0   ;;  %vm1920_vm0 = vmmov 0   ;;  %v1691_v2 = vld [vmem:[#allocation6 + $0x78] sm:$0xff]   ;;  %v1693_v4 = vld [vmem:[#allocation6 + $0x70] sm:$0xff]   ;;  %v1695_v6 = vld [vmem:[#allocation6 + $0x68] sm:$0xff]  }
  0x54   : > { %1892 = vsyncadd (%p2242_p8), [#allocation7], 4294959104  ;;  %1499 = vmatprep.subr.bf16.mxu0 %v1918_v0  ;;  %1519 = vmatprep.subr.bf16.mxu1 %v1918_v0  ;;  %274 = vst [vmem:[#allocation2 + $0x4] sm:$0xf] %v1919_v1  ;;  %v1692_v3 = vld [vmem:[#allocation6 + $0x38] sm:$0xff]   ;;  %v1694_v5 = vld [vmem:[#allocation6 + $0x30] sm:$0xff]  }
  0x55   : > { %1515 = vmatprep.mubr.msk.bf16.mxu0 %vm1920_vm0, %v1918_v0  ;;  %1535 = vmatprep.mubr.msk.bf16.mxu1 %vm1920_vm0, %v1918_v0  ;;  %v1696_v7 = vld [vmem:[#allocation6 + $0x28] sm:$0xff]   ;;  %v1697_v8 = vld [vmem:[#allocation6 + $0x60] sm:$0xff]   ;;  %v1699_v10 = vld [vmem:[#allocation6 + $0x58] sm:$0xff]   ;;  %vm324_vm1 = vsmask.f32 4352  ;;  %vm435_vm2 = vcmask 1044480  }
  0x56   : > { %1500 = vmatpush3.bf16.msra.mxu0 %v1691_v2  ;;  %1520 = vmatpush3.bf16.msra.mxu1 %v1692_v3  ;;  %v1698_v9 = vld [vmem:[#allocation6 + $0x20] sm:$0xff]   ;;  %v1700_v11 = vld [vmem:[#allocation6 + $0x18] sm:$0xff]   ;;  %v1701_v13 = vld [vmem:[#allocation6 + $0x50] sm:$0xff]   ;;  %s1411_s6 = sshll.u32 %s1973_s22, 7  ;;  %s271_s7 = scalar_lea.vmem [#allocation9], %s1327_s8 }
  0x57   : > { %1501 = vmatprep.subr.bf16.mxu0 %v1918_v0  ;;  %1521 = vmatprep.subr.bf16.mxu1 %v1918_v0  ;;  %v275_v12 = vld [vmem:[%s2094_s13] sm:$0xff]   ;;  %v1703_v15 = vld [vmem:[#allocation6 + $0x48] sm:$0xff]   ;;  %v1705_v18 = vld [vmem:[#allocation6 + $0x40] sm:$0xff]   ;;  %s1229_s28 = sshll.u32 %s271_s7, 4  ;;  %s2184_s16 = scalar_lea.hbm %s2226_s5, %s1411_s6  ;;  %s1230_s28 = int_to_ptr.vmem [resolvable:$true] %s1229_s28 }
  0x58   : > { %277 = vst [vmem:[#allocation2 + $0x8] sm:$0xff] %v275_v12   ;;  %v1702_v14 = vld [vmem:[#allocation6 + $0x10] sm:$0xff]   ;;  %v1704_v17 = vld [vmem:[#allocation6 + $0x8] sm:$0xff]   ;;  %v1706_v21 = vld [vmem:[#allocation6] sm:$0xff]   ;;  %s1216_s29 = scalar_lea.sflag [#allocation5], %s2088_s30  ;;  %s1843_s13 = scalar_lea.vmem %s1230_s28, 128 }
  0x59   : > { %v1710_v35 = vld [vmem:[#allocation6 + $0xb8] sm:$0xff]   ;;  %v1711_v40 = vld [vmem:[#allocation6 + $0xb0] sm:$0xff]   ;;  %v1712_v41 = vld [vmem:[#allocation6 + $0xa8] sm:$0xff]   ;;  %p1844_p5 = scmp.ne.s32.totalorder %s1230_s28, %s1843_s13  ;;  %p2243_p2 = scmp.ne.s32.totalorder %s2236_s23, 0 }
  0x5a   : > { %1502 = vmatpush3.bf16.msra.mxu0 %v1693_v4  ;;  %1522 = vmatpush3.bf16.msra.mxu1 %v1694_v5  ;;  %v1713_v42 = vld [vmem:[#allocation6 + $0xa0] sm:$0xff]   ;;  %v1714_v43 = vld [vmem:[#allocation6 + $0x98] sm:$0xff]   ;;  %v1715_v44 = vld [vmem:[#allocation6 + $0x90] sm:$0xff]   ;;  %s1921_s22 = smov [#allocation9]  }
  0x5b   : > { %1503 = vmatprep.subr.bf16.mxu0 %v1918_v0  ;;  %1523 = vmatprep.subr.bf16.mxu1 %v1918_v0  ;;  %v279_v16 = vld [vmem:[#allocation2 + $0x4] sm:$0x8]  ;;  %v1716_v45 = vld [vmem:[#allocation6 + $0x88] sm:$0xff]   ;;  %v1719_v48 = vld [vmem:[#allocation6 + $0xf8] sm:$0xff]   ;;  %p1845_p7 = pnand %p1844_p5, %p2243_p2  ;;  %s1847_s8 = sshll.u32 %s1921_s22, 4  ;;  %s1848_s8 = int_to_ptr.vmem [resolvable:$false] %s1847_s8 }
  0x5c   : > { %v1717_v46 = vld [vmem:[#allocation6 + $0x80] sm:$0xff]   ;;  %v1720_v49 = vld [vmem:[#allocation6 + $0x138] sm:$0xff]   ;;  %v1721_v50 = vld [vmem:[#allocation6 + $0xf0] sm:$0xff]   ;;  %s1849_s24 = scalar_lea.vmem %s1848_s8, 256  ;;  %p1850_p13 = scmp.lt.s32.totalorder %s1230_s28, %s1848_s8 }
  0x5d   : > { %v1722_v51 = vld [vmem:[#allocation6 + $0x130] sm:$0xff]   ;;  %v1723_v52 = vld [vmem:[#allocation6 + $0xe8] sm:$0xff]   ;;  %v1725_v54 = vld [vmem:[#allocation6 + $0xe0] sm:$0xff]   ;;  %p1846_p12 = pneg %p1845_p7  ;;  %p1851_p0 = scmp.lt.s32.totalorder %s1849_s24, %s1843_s13 }
  0x5e   : > { %1504 = vmatpush3.bf16.msra.mxu0 %v1695_v6  ;;  %1524 = vmatpush3.bf16.msra.mxu1 %v1696_v7  ;;  %v1724_v53 = vld [vmem:[#allocation6 + $0x128] sm:$0xff]   ;;  %v1726_v55 = vld [vmem:[#allocation6 + $0x120] sm:$0xff]   ;;  %v1727_v56 = vld [vmem:[#allocation6 + $0xd8] sm:$0xff]  }
  0x5f   : > { %1505 = vmatprep.subr.bf16.mxu0 %v1918_v0  ;;  %1525 = vmatprep.subr.bf16.mxu1 %v1918_v0  ;;  %v280_v19 = vld [vmem:[#allocation2 + $0x8] sm:$0xf]  ;;  %v298_v20 = vld [vmem:[#allocation2 + $0xc] sm:$0xf]  ;;  %v1728_v57 = vld [vmem:[#allocation6 + $0x118] sm:$0xff]   ;;  %p1852_p10 = por %p1851_p0, %p1850_p13 }
  0x60   : > { %v1331_v22 = vcombine.low %v279_v16, %v280_v19  ;;  %v1332_v23 = vcombine.low %v298_v20, %v298_v20  ;;  %v1709_v24 = vld [vmem:[#allocation2 + $0xc] ss:$0 sps:$4 sm:$0x77]   ;;  %v1350_v47 = vcombine.low %v280_v19, %v298_v20  ;;  %v1729_v58 = vld [vmem:[#allocation6 + $0xd0] sm:$0xff]   ;;  %v1733_v62 = vld [vmem:[#allocation6 + $0xc0] sm:$0xff]  }
  0x61   : > { %v437_v30 = vrot.slane %v1709_v24, 3  ;;  %v1730_v59 = vld [vmem:[#allocation6 + $0x110] sm:$0xff]   ;;  %v1731_v60 = vld [vmem:[#allocation6 + $0xc8] sm:$0xff]   ;;  %v1734_v63 = vld [vmem:[#allocation6 + $0x100] sm:$0xff]   ;;  %p1853_p3 = pnand %p1852_p10, %p1846_p12 }
  0x62   : > { %1506 = vmatpush3.bf16.msra.mxu0 %v1697_v8  ;;  %1526 = vmatpush3.bf16.msra.mxu1 %v1698_v9  ;;  %v326_v25 = vshrl.u32 %v1331_v22, 16  ;;  %v329_v26 = vshll.u32 %v1331_v22, 16  ;;  %v334_v27 = vshrl.u32 %v1332_v23, 16  ;;  %v337_v28 = vshll.u32 %v1332_v23, 16  ;;  %v1732_v61 = vld [vmem:[#allocation6 + $0x108] sm:$0xff]  }
  0x63   : > { %1507 = vmatprep.subr.bf16.mxu0 %v1918_v0  ;;  %1527 = vmatprep.subr.bf16.mxu1 %v1918_v0  ;;  %v436_v29 = vrot.slane %v1331_v22, 3  ;;  %v1359_v12 = vld [vmem:[%s2223_s2] ss:$0 sm:$0xff]  ;;  %v660_v23 = vld [vmem:[#allocation2 + $0x4] sm:$0x8] }
  0x64   : > { %v328_v31 = vrot.slane %v326_v25, 3  ;;  %v331_v32 = vrot.slane %v329_v26, 4  ;;  %v336_v33 = vrot.slane %v334_v27, 3  ;;  %v339_v34 = vrot.slane %v337_v28, 4 }
  0x65   : > { %v438_v38 = vsel %vm435_vm2, %v436_v29, %v437_v30 }
  0x66   : > { %1508 = vmatpush3.bf16.msra.mxu0 %v1699_v10  ;;  %1528 = vmatpush3.bf16.msra.mxu1 %v1700_v11  ;;  %v332_v36 = vor.u32 %v331_v32, %v328_v31  ;;  %v340_v37 = vor.u32 %v339_v34, %v336_v33 }
  0x67   : > { %1509 = vmatprep.subr.bf16.mxu0 %v1918_v0  ;;  %1529 = vmatprep.subr.bf16.mxu1 %v1918_v0 }
  0x68   : > { %v341_v39 = vsel %vm324_vm1, %v332_v36, %v340_v37 }
  0x6a   : > { %1510 = vmatpush3.bf16.msra.mxu0 %v1701_v13  ;;  %1530 = vmatpush3.bf16.msra.mxu1 %v1702_v14 }
  0x6b   : > { %1511 = vmatprep.subr.bf16.mxu0 %v1918_v0  ;;  %1531 = vmatprep.subr.bf16.mxu1 %v1918_v0 }
  0x6e   : > { %1512 = vmatpush3.bf16.msra.mxu0 %v1703_v15  ;;  %1532 = vmatpush3.bf16.msra.mxu1 %v1704_v17 }
  0x6f   : > { %1513 = vmatprep.subr.bf16.mxu0 %v1918_v0  ;;  %1533 = vmatprep.subr.bf16.mxu1 %v1918_v0 }
  0x72   : > { %1514 = vmatpush3.bf16.msra.mxu0 %v1705_v18  ;;  %1534 = vmatpush3.bf16.msra.mxu1 %v1706_v21 }
  0x73   : > { %1539 = vmatprep.subr.bf16.mxu0 %v1918_v0  ;;  %1559 = vmatprep.subr.bf16.mxu1 %v1918_v0 }
  0x75   : > { %1516 = vmatmul.mubr.bf16.vlgmr.msra.gmra.mxu0 %v341_v39  ;;  %1536 = vmatmul.mubr.bf16.vlgmr.msra.gmra.mxu1 %v438_v38 }
  0x76   : > { %1540 = vmatpush3.bf16.msra.mxu0 %v1710_v35  ;;  %1555 = vmatprep.mubr.msk.bf16.mxu0 %vm1920_vm0, %v1918_v0 }
  0x77   : > { %1541 = vmatprep.subr.bf16.mxu0 %v1918_v0  ;;  %1575 = vmatprep.mubr.msk.bf16.mxu1 %vm1920_vm0, %v1918_v0 }
  0x78   : > { %1560 = vmatpush3.bf16.msra.mxu1 %v1720_v49  ;;  %v1744_v49 = vld [vmem:[#allocation6 + $0x148] sm:$0xff]  }
  0x79   : > { %1561 = vmatprep.subr.bf16.mxu1 %v1918_v0 }
  0x7a   : > { %1542 = vmatpush3.bf16.msra.mxu0 %v1711_v40 }
  0x7b   : > { %1543 = vmatprep.subr.bf16.mxu0 %v1918_v0 }
  0x7c   : > { %1562 = vmatpush3.bf16.msra.mxu1 %v1722_v51 }
  0x7d   : > { %1563 = vmatprep.subr.bf16.mxu1 %v1918_v0 }
  0x7e   : > { %1544 = vmatpush3.bf16.msra.mxu0 %v1712_v41 }
  0x7f   : > { %1545 = vmatprep.subr.bf16.mxu0 %v1918_v0 }
  0x80   : > { %1564 = vmatpush3.bf16.msra.mxu1 %v1724_v53  ;;  %v1748_v53 = vld [vmem:[#allocation8 + $0x38] sm:$0xff]  }
  0x81   : > { %1565 = vmatprep.subr.bf16.mxu1 %v1918_v0 }
  0x82   : > { %1546 = vmatpush3.bf16.msra.mxu0 %v1713_v42  ;;  %v1738_v42 = vld [vmem:[#allocation6 + $0x178] sm:$0xff]  }
  0x83   : > { %1547 = vmatprep.subr.bf16.mxu0 %v1918_v0 }
  0x84   : > { %1566 = vmatpush3.bf16.msra.mxu1 %v1726_v55  ;;  %v1750_v55 = vld [vmem:[#allocation8 + $0x30] sm:$0xff]  }
  0x85   : > { %1567 = vmatprep.subr.bf16.mxu1 %v1918_v0 }
  0x86   : > { %1548 = vmatpush3.bf16.msra.mxu0 %v1714_v43 }
  0x87   : > { %1549 = vmatprep.subr.bf16.mxu0 %v1918_v0 }
  0x88   : > { %1568 = vmatpush3.bf16.msra.mxu1 %v1728_v57  ;;  %v1752_v57 = vld [vmem:[#allocation8 + $0x28] sm:$0xff]  }
  0x89   : > { %1569 = vmatprep.subr.bf16.mxu1 %v1918_v0 }
  0x8a   : > { %1550 = vmatpush3.bf16.msra.mxu0 %v1715_v44  ;;  %v1739_v44 = vld [vmem:[#allocation6 + $0x170] sm:$0xff]  }
  0x8b   : > { %1551 = vmatprep.subr.bf16.mxu0 %v1918_v0 }
  0x8c   : > { %1570 = vmatpush3.bf16.msra.mxu1 %v1730_v59  ;;  %v1754_v59 = vld [vmem:[#allocation8 + $0x20] sm:$0xff]  }
  0x8d   : > { %1571 = vmatprep.subr.bf16.mxu1 %v1918_v0 }
  0x8e   : > { %1552 = vmatpush3.bf16.msra.mxu0 %v1716_v45  ;;  %v1740_v45 = vld [vmem:[#allocation6 + $0x168] sm:$0xff]  }
  0x8f   : > { %1553 = vmatprep.subr.bf16.mxu0 %v1918_v0 }
  0x90   : > { %1572 = vmatpush3.bf16.msra.mxu1 %v1732_v61  ;;  %v1757_v61 = vld [vmem:[#allocation8 + $0x50] sm:$0xff]  }
  0x91   : > { %1573 = vmatprep.subr.bf16.mxu1 %v1918_v0 }
  0x92   : > { %1554 = vmatpush3.bf16.msra.mxu0 %v1717_v46  ;;  %v1741_v46 = vld [vmem:[#allocation6 + $0x160] sm:$0xff]  }
  0x93   : > { %1579 = vmatprep.subr.bf16.mxu0 %v1918_v0 }
  0x94   : > { %1574 = vmatpush3.bf16.msra.mxu1 %v1734_v63  ;;  %v1759_v63 = vld [vmem:[#allocation8 + $0x48] sm:$0xff]  }
  0x95   : > { %1556 = vmatmul.mubr.bf16.vlgmr.msra.gmra.mxu0 %v1350_v47  ;;  %1599 = vmatprep.subr.bf16.mxu1 %v1918_v0  ;;  %v1742_v47 = vld [vmem:[#allocation6 + $0x158] sm:$0xff]  }
  0x96   : > { %1595 = vmatprep.mubr.msk.bf16.mxu0 %vm1920_vm0, %v1918_v0  ;;  %1580 = vmatpush3.bf16.msra.mxu0 %v1719_v48  ;;  %v1743_v48 = vld [vmem:[#allocation6 + $0x150] sm:$0xff]  }
  0x97   : > { %1581 = vmatprep.subr.bf16.mxu0 %v1918_v0 }
  0x9a   : > { %1582 = vmatpush3.bf16.msra.mxu0 %v1721_v50  ;;  %v1745_v50 = vld [vmem:[#allocation6 + $0x140] sm:$0xff]  }
  0x9b   : > { %1583 = vmatprep.subr.bf16.mxu0 %v1918_v0 }
  0x9e   : > { %1584 = vmatpush3.bf16.msra.mxu0 %v1723_v52  ;;  %v1747_v52 = vld [vmem:[#allocation8 + $0x78] sm:$0xff]  }
  0x9f   : > { %1585 = vmatprep.subr.bf16.mxu0 %v1918_v0 }
  0xa2   : > { %1586 = vmatpush3.bf16.msra.mxu0 %v1725_v54  ;;  %v1749_v54 = vld [vmem:[#allocation8 + $0x70] sm:$0xff]  }
  0xa3   : > { %1587 = vmatprep.subr.bf16.mxu0 %v1918_v0 }
  0xa6   : > { %1588 = vmatpush3.bf16.msra.mxu0 %v1727_v56  ;;  %v1751_v56 = vld [vmem:[#allocation8 + $0x68] sm:$0xff]  }
  0xa7   : > { %1589 = vmatprep.subr.bf16.mxu0 %v1918_v0 }
  0xaa   : > { %1590 = vmatpush3.bf16.msra.mxu0 %v1729_v58  ;;  %v1753_v58 = vld [vmem:[#allocation8 + $0x60] sm:$0xff]  }
  0xab   : > { %1591 = vmatprep.subr.bf16.mxu0 %v1918_v0 }
  0xae   : > { %1592 = vmatpush3.bf16.msra.mxu0 %v1731_v60  ;;  %v1756_v60 = vld [vmem:[#allocation8 + $0x18] sm:$0xff]  }
  0xaf   : > { %1593 = vmatprep.subr.bf16.mxu0 %v1918_v0 }
  0xb2   : > { %1594 = vmatpush3.bf16.msra.mxu0 %v1733_v62  ;;  %v1758_v62 = vld [vmem:[#allocation8 + $0x10] sm:$0xff]  }
  0xb3   : > { %1477 = vmatprep.subr.bf16.mxu0 %v1747_v52 }
 0x135   : > { %v425_v1 = vpop.f32.mrf.mxu0  ;;  %v522_v2 = vpop.f32.mrf.mxu1 }
 0x136   : > { %v523_v9 = vadd.f32 %v522_v2, %v425_v1  ;;  %v1760_v1 = vld [vmem:[#allocation8 + $0x8] sm:$0xff]   ;;  %v1761_v2 = vld [vmem:[#allocation8 + $0x40] sm:$0xff]  }
 0x137   : > { %v1517_v3 = vpop.f32.mrf.mxu0  ;;  %v1537_v4 = vpop.f32.mrf.mxu1 }
 0x138   : > { %v1762_v3 = vld [vmem:[#allocation8] sm:$0xff]  }
 0x139   : > { %v428_v5 = vpop.f32.mrf.mxu0  ;;  %v525_v6 = vpop.f32.mrf.mxu1 }
 0x13a   : > { %v526_v14 = vadd.f32 %v525_v6, %v428_v5 }
 0x13b   : > { %v1518_v7 = vpop.f32.mrf.mxu0  ;;  %v1538_v8 = vpop.f32.mrf.mxu1 }
 0x155   : > { %v630_v10 = vpop.f32.mrf.mxu0 }
 0x156   : > { %v637_v11 = vadd.f32 %v630_v10, %v523_v9 }
 0x157   : > { %v1557_v13 = vpop.f32.mrf.mxu0 }
 0x158   : > { %v646_v16 = vadd.f32 %v1359_v12, %v637_v11 }
 0x159   : > { %v633_v15 = vpop.f32.mrf.mxu0 }
 0x15a   : > { %v638_v17 = vadd.f32 %v633_v15, %v526_v14  ;;  %v648_v20 = vmax.f32 %v646_v16, 0.0  ;;  %v1391_v15 = vld [vmem:[%s2223_s2 + $0x1] ss:$0 sm:$0xff] }
 0x15b   : > { %v1558_v18 = vpop.f32.mrf.mxu0 }
 0x15c   : > { %v647_v19 = vadd.f32 %v1359_v12, %v638_v17 }
 0x15e   : > { %v649_v21 = vmax.f32 %v647_v19, 0.0 }
 0x160   : > { %v1420_v22 = vpack.c.bf16 %v649_v21, %v648_v20 }
 0x162   : > { %1422 = vst [vmem:[#allocation2 + $0x8] sm:$0xff] %v1420_v22  }
 0x169   : > { %v661_v24 = vld [vmem:[#allocation2 + $0x8] sm:$0xf]  ;;  %v680_v25 = vld [vmem:[#allocation2 + $0xc] sm:$0xf] }
 0x16a   : > { %v1362_v26 = vcombine.low %v660_v23, %v661_v24  ;;  %v1736_v27 = vld [vmem:[#allocation2 + $0xc] ss:$0 sps:$4 sm:$0x77]   ;;  %v1363_v28 = vcombine.low %v680_v25, %v680_v25  ;;  %v1381_v51 = vcombine.low %v661_v24, %v680_v25 }
 0x16b   : > { %v817_v30 = vrot.slane %v1736_v27, 3 }
 0x16c   : > { %v816_v29 = vrot.slane %v1362_v26, 3  ;;  %v707_v31 = vshrl.u32 %v1362_v26, 16  ;;  %v710_v32 = vshll.u32 %v1362_v26, 16  ;;  %v715_v33 = vshrl.u32 %v1363_v28, 16 }
 0x16d   : > { %v718_v34 = vshll.u32 %v1363_v28, 16 }
 0x16e   : > { %v818_v35 = vsel %vm435_vm2, %v816_v29, %v817_v30  ;;  %v709_v36 = vrot.slane %v707_v31, 3  ;;  %v712_v37 = vrot.slane %v710_v32, 4  ;;  %v717_v38 = vrot.slane %v715_v33, 3  ;;  %v1392_v30 = vld [vmem:[%s2225_s4] ss:$0 sm:$0xff] }
 0x16f   : > { %1596 = vmatmul.mubr.bf16.vlgmr.msra.gmra.mxu0 %v818_v35  ;;  %v720_v39 = vrot.slane %v718_v34, 4 }
 0x170   : > { %v713_v40 = vor.u32 %v712_v37, %v709_v36  ;;  %1478 = vmatpush3.bf16.msra.mxu0 %v1748_v53 }
 0x171   : > { %v721_v41 = vor.u32 %v720_v39, %v717_v38  ;;  %1479 = vmatprep.subr.bf16.mxu0 %v1749_v54 }
 0x173   : > { %v722_v43 = vsel %vm324_vm1, %v713_v40, %v721_v41 }
 0x174   : > { %1576 = vmatmul.mubr.bf16.vlgmr.msra.gmra.mxu1 %v722_v43  ;;  %1480 = vmatpush3.bf16.msra.mxu0 %v1750_v55 }
 0x175   : > { %1600 = vmatpush3.bf16.msra.mxu1 %v1738_v42  ;;  %1615 = vmatprep.mubr.msk.bf16.mxu1 %vm1920_vm0, %v1918_v0 }
 0x176   : > { %1601 = vmatprep.subr.bf16.mxu1 %v1918_v0  ;;  %1481 = vmatprep.subr.bf16.mxu0 %v1751_v56 }
 0x178   : > { %1482 = vmatpush3.bf16.msra.mxu0 %v1752_v57 }
 0x179   : > { %1602 = vmatpush3.bf16.msra.mxu1 %v1739_v44  ;;  %1483 = vmatprep.subr.bf16.mxu0 %v1753_v58 }
 0x17a   : > { %1603 = vmatprep.subr.bf16.mxu1 %v1918_v0 }
 0x17c   : > { %1484 = vmatpush3.bf16.msra.mxu0 %v1754_v59 }
 0x17d   : > { %1604 = vmatpush3.bf16.msra.mxu1 %v1740_v45 }
 0x17e   : > { %1605 = vmatprep.subr.bf16.mxu1 %v1918_v0 }
 0x181   : > { %1606 = vmatpush3.bf16.msra.mxu1 %v1741_v46 }
 0x182   : > { %1607 = vmatprep.subr.bf16.mxu1 %v1918_v0 }
 0x185   : > { %1608 = vmatpush3.bf16.msra.mxu1 %v1742_v47 }
 0x186   : > { %1609 = vmatprep.subr.bf16.mxu1 %v1918_v0 }
 0x189   : > { %1610 = vmatpush3.bf16.msra.mxu1 %v1743_v48 }
 0x18a   : > { %1611 = vmatprep.subr.bf16.mxu1 %v1918_v0 }
 0x18d   : > { %1612 = vmatpush3.bf16.msra.mxu1 %v1744_v49 }
 0x18e   : > { %1613 = vmatprep.subr.bf16.mxu1 %v1918_v0  ;;  %v1755_v0 = vld [vmem:[#allocation8 + $0x58] sm:$0xff]  }
 0x18f   : > { %1485 = vmatprep.subr.bf16.mxu0 %v1755_v0 }
 0x190   : > { %1486 = vmatpush3.bf16.msra.mxu0 %v1756_v60 }
 0x191   : > { %1614 = vmatpush3.bf16.msra.mxu1 %v1745_v50  ;;  %1487 = vmatprep.subr.bf16.mxu0 %v1757_v61 }
 0x194   : > { %1616 = vmatmul.mubr.bf16.vlgmr.msra.gmra.mxu1 %v1381_v51  ;;  %1488 = vmatpush3.bf16.msra.mxu0 %v1758_v62 }
 0x195   : > { %1489 = vmatprep.subr.bf16.mxu0 %v1759_v63 }
 0x198   : > { %1490 = vmatpush3.bf16.msra.mxu0 %v1760_v1 }
 0x199   : > { %1491 = vmatprep.subr.bf16.mxu0 %v1761_v2 }
 0x19c   : > { %1492 = vmatpush3.bf16.msra.mxu0 %v1762_v3 }
 0x22f   : > { %v902_v4 = vpop.f32.mrf.mxu0 }
 0x231   : > { %v1597_v5 = vpop.f32.mrf.mxu0 }
 0x233   : > { %v905_v6 = vpop.f32.mrf.mxu0 }
 0x234   : > { %v806_v7 = vpop.f32.mrf.mxu1 }
 0x235   : > { %v1598_v8 = vpop.f32.mrf.mxu0  ;;  %v903_v12 = vadd.f32 %v902_v4, %v806_v7 }
 0x236   : > { %v1577_v9 = vpop.f32.mrf.mxu1 }
 0x238   : > { %v809_v10 = vpop.f32.mrf.mxu1 }
 0x239   : > { %v906_v17 = vadd.f32 %v905_v6, %v809_v10 }
 0x23a   : > { %v1578_v11 = vpop.f32.mrf.mxu1 }
 0x254   : > { %v1010_v13 = vpop.f32.mrf.mxu1 }
 0x255   : > { %v1017_v14 = vadd.f32 %v1010_v13, %v903_v12 }
 0x256   : > { %v1617_v16 = vpop.f32.mrf.mxu1 }
 0x257   : > { %v1027_v19 = vadd.f32 %v1391_v15, %v1017_v14 }
 0x258   : > { %v1013_v18 = vpop.f32.mrf.mxu1 }
 0x259   : > { %v1018_v20 = vadd.f32 %v1013_v18, %v906_v17  ;;  %v1029_v23 = vmax.f32 %v1027_v19, 0.0 }
 0x25a   : > { %v1618_v21 = vpop.f32.mrf.mxu1 }
 0x25b   : > { %v1028_v22 = vadd.f32 %v1391_v15, %v1018_v20 }
 0x25d   : > { %v1030_v24 = vmax.f32 %v1028_v22, 0.0 }
 0x25f   : > { %v1031_v25 = vpack.c.bf16 %v1030_v24, %v1029_v23 }
 0x261   : > { %v1034_v26 = vunpack.i.h.s16 %v1031_v25  ;;  %v1393_v28 = vpack.c.b16 %v1031_v25, %v1031_v25 }
 0x263   : > { %v1075_v27 = vpack.c.b16 %v1034_v26, %v1034_v26 }
 0x265   : > { %1206 = vmatprep.mubr.bf16.mxu0 %v1075_v27 }
 0x266   : > { %1207 = vmatmul.mubr.bf16.vlgmr.msra.gmra.mxu0 %v1393_v28 }
 0x326   : > { %v1493_v29 = vpop.f32.mrf.mxu0 }
 0x328   : > { %v1494_v31 = vpop.f32.mrf.mxu0 }
 0x329   : > { %v1495_v32 = vadd.f32 %v1494_v31, %v1493_v29 }
 0x32a   : > { %v1496_v33 = vpop.f32.mrf.mxu0 }
 0x32b   : > { %v1209_v34 = vadd.f32 %v1495_v32, %v1392_v30 }
 0x32c   : > { %v1497_v35 = vpop.f32.mrf.mxu0 }
 0x32d   : > { %1214 = vst [vmem:[%s271_s7] sm:$0xff] %v1209_v34 }
 0x32e   : > { %1856 = shalt.err (!%p1853_p3)
}
 0x32f   : > { %s1857_s26 = scalar_lea.hbm %s2184_s16, 128  ;;  %s1861_s10 = scalar_lea.hbm %s2226_s5, 256 }
 0x330   : > { %p1858_p11 = scmp.ne.s32.totalorder %s2184_s16, %s1857_s26  ;;  %p1862_p4 = scmp.lt.s32.totalorder %s2184_s16, %s2226_s5 }
 0x331   : > { %p1863_p6 = scmp.lt.s32.totalorder %s1861_s10, %s1857_s26 }
 0x332   : > { %p1859_p9 = pnand %p1858_p11, %p2243_p2 }
 0x333   : > { %p1864_p8 = por %p1863_p6, %p1862_p4 }
 0x334   : > { %p1860_p1 = pneg %p1859_p9 }
 0x336   : > { %p1865_p5 = pnand %p1864_p8, %p1860_p1 }
 0x338   : > { %1868 = shalt.err (!%p1865_p5)
}
 0x339   : > { %1629 = dma.vmem_to_hbm [thread:$0]  (%p2243_p2), %s1230_s28, 128, %s2184_s16, %s1216_s29  }
 0x33a PF: > { %s1241_s6 = sand.u32 1, %s1899_s18   ;;  %p2244_p7 = scmp.ne.s32.totalorder %s2233_s25, 0 }
 0x33b   : > { %p2245_p12 = scmp.ge.s32.totalorder %s1911_s21, 2  ;;  %s1242_s7 = scalar_lea.sflag [#allocation5], %s1241_s6 }
 0x33d   : > { %p1643_p13 = pnand %p2245_p12, %p2244_p7 }
 0x33f   : > { %p1644_p0 = pneg %p1643_p13 }
 0x341   : > { %1894 = dma.done.wait (%p1644_p0), %s1242_s7, 128  }
 0x342   : > { %1896 = vsyncadd (%p1644_p0), %s1242_s7, 4294967168  ;;  %p19_p10 = scmp.ge.s32.totalorder %s2030_s15, 4   ;;  %s2246_s18 = smov %s1903_s19 }
 0x343   : > { %s2247_s19 = smov %s1907_s20  ;;  %s2248_s20 = smov %s2046_s27 }
 0x344   : > { %s2249_s21 = smov %s2030_s15  ;;  %21 = sbr.rel (!%p19_p10) target bundleno = 6 (0x6), region = 99 }
 0x349   :  { %1247 = vsyncpa [#allocation4], 1 }
 0x34a   :  { %1249 = vsyncpa [#allocation4 + $0x1], 1 }
 0x34b   :  { %1250 = vsyncpa [#allocation7], 1 }
 0x34c   :  { %1251 = vsyncpa [#allocation5], 1 }
 0x34d   :  { %1253 = vsyncpa [#allocation5 + $0x1], 1 }

</bundles_post_ra>
